<compile_context>
chip_gen: v7x
topology: tpu7x:2x2x1
jax: 0.10.0
libtpu: 0.0.40
codegen_flags: <defaults>
</compile_context>

<pallas_src>
import jax
import jax.numpy as jnp
from jax import lax
from jax.experimental import pallas as pl
from jax.experimental.pallas import tpu as pltpu


def allstm_kernel(x_ref, w_ih_ref, w_hh_ref, b_ref, w_head_ref, b_head_ref,
                  out_ref, xproj_ref):
    """x_ref: (T, B, D) time-major input; out_ref: (B, 128) lane-dense heads.

    xproj_ref: (T, B, 4H) VMEM scratch holding the hoisted input projection.
    """
    T, B, D = x_ref.shape
    H = w_hh_ref.shape[0]

    # ---- Hoisted input projection: one MXU matmul + bias for all T steps, ----
    # ---- stored to an explicit VMEM scratch (not carried in vregs).       ----
    x_flat = x_ref[...].reshape(T * B, D)                        # layout-preserving
    xproj_ref[...] = (
        jnp.dot(x_flat, w_ih_ref[...], preferred_element_type=jnp.float32)
        + b_ref[...]).reshape(T, B, 4 * H)                       # (T, B, 4H)

    # ---- Serial recurrence: state in vregs, fori_loop fully unrolled so the ----
    # ---- LLO scheduler sees everything but live ranges stay bounded.       ----
    def step(t, carry):
        h, c = carry
        gates = (jnp.dot(h, w_hh_ref[...], preferred_element_type=jnp.float32)
                 + xproj_ref[t])                                 # (B, 4H)
        # Packed gate order [i, f, o, g]: one tanh-form sigmoid over 3H lanes
        # (single EUP push) + one tanh over the last H lanes.
        sig = 0.5 * jnp.tanh(0.5 * gates[:, 0:3 * H]) + 0.5
        i_g = sig[:, 0:H]
        f_g = sig[:, H:2 * H]
        o_g = sig[:, 2 * H:3 * H]
        g_g = jnp.tanh(gates[:, 3 * H:4 * H])
        c_new = f_g * c + i_g * g_g
        h_new = o_g * jnp.tanh(c_new)
        return h_new, c_new

    h0 = jnp.zeros((B, H), jnp.float32)
    c0 = jnp.zeros((B, H), jnp.float32)
    h, _ = lax.fori_loop(0, T, step, (h0, c0), unroll=True)

    # Dropout is identity at inference time -> no-op.
    # Lane-dense head matmul + unmasked store: (B, H) @ (H, 128) -> (B, 128).
    out_ref[...] = (jnp.dot(h, w_head_ref[...],
                            preferred_element_type=jnp.float32)
                    + b_head_ref[...])


def allstm_forward(x, params):
    """x: (B, T, D) batch-first, like the PyTorch module. Returns (down, med, up)."""
    B, T, D = x.shape
    H = params["w_hh"].shape[0]
    L = params["w_head"].shape[1]

    # Time-major inside the kernel so every per-step access is a cheap
    # leading-axis index; at B=T=8 this transpose is negligible.
    x_tm = jnp.transpose(x, (1, 0, 2))                           # (T, B, D)

    out = pl.pallas_call(
        allstm_kernel,
        out_shape=jax.ShapeDtypeStruct((B, L), jnp.float32),
        in_specs=[pl.BlockSpec(memory_space=pltpu.MemorySpace.VMEM)] * 6,
        out_specs=pl.BlockSpec(memory_space=pltpu.MemorySpace.VMEM),
        scratch_shapes=[pltpu.VMEM((T, B, 4 * H), jnp.float32)],
    )(x_tm, params["w_ih"], params["w_hh"], params["b"],
      params["w_head"], params["b_head"])

    down = out[:, 0:1]
    med = out[:, 1:2]
    up = out[:, 2:3]
    return down, med, up


def pack_pytorch_lstm_params(weight_ih, weight_hh, bias_ih, bias_hh,
                             w_down, b_down, w_med, b_med, w_up, b_up,
                             head_lanes=128):
    """Convert PyTorch ALLSTMModel weights into this kernel's packed layout.

    PyTorch packs LSTM gate rows as [i, f, g, o] in (4H, D) / (4H, H)
    matrices; the kernel wants column-packed [i, f, o, g] in (D, 4H) / (H, 4H),
    plus the three 1-output Linear heads packed lane-dense into (H, 128).
    """
    weight_ih = jnp.asarray(weight_ih, jnp.float32)
    weight_hh = jnp.asarray(weight_hh, jnp.float32)
    H4, D = weight_ih.shape
    assert H4 % 4 == 0, "weight_ih first dim must be 4*hidden_size"
    H = H4 // 4
    assert weight_hh.shape == (H4, H), "weight_hh must be (4H, H)"
    perm = jnp.concatenate([jnp.arange(0, H),            # i
                            jnp.arange(H, 2 * H),        # f
                            jnp.arange(3 * H, 4 * H),    # o
                            jnp.arange(2 * H, 3 * H)])   # g
    w_ih = weight_ih[perm, :].T                           # (D, 4H)
    w_hh = weight_hh[perm, :].T                           # (H, 4H)
    b = (jnp.asarray(bias_ih, jnp.float32)
         + jnp.asarray(bias_hh, jnp.float32))[perm].reshape(1, 4 * H)

    w_head = jnp.zeros((H, head_lanes), jnp.float32)
    w_head = (w_head.at[:, 0:1].set(jnp.asarray(w_down, jnp.float32).reshape(H, 1))
                    .at[:, 1:2].set(jnp.asarray(w_med, jnp.float32).reshape(H, 1))
                    .at[:, 2:3].set(jnp.asarray(w_up, jnp.float32).reshape(H, 1)))
    b_head = jnp.zeros((1, head_lanes), jnp.float32)
    b_head = b_head.at[0, 0:3].set(jnp.stack(
        [jnp.asarray(b_down, jnp.float32).reshape(()),
         jnp.asarray(b_med, jnp.float32).reshape(()),
         jnp.asarray(b_up, jnp.float32).reshape(())]))
    return {"w_ih": w_ih, "w_hh": w_hh, "b": b,
            "w_head": w_head, "b_head": b_head}


def init_params(key, input_size, hidden_size, output_size=1, head_lanes=128):
    """Deterministic init mimicking PyTorch's U(-1/sqrt(H), 1/sqrt(H)).

    Gate blocks are packed in [i, f, o, g] order (see header comment).
    """
    assert output_size == 1
    k = 1.0 / jnp.sqrt(jnp.float32(hidden_size))
    keys = jax.random.split(key, 8)

    def u(kk, shape):
        return jax.random.uniform(kk, shape, jnp.float32, -k, k)

    w_ih = u(keys[0], (input_size, 4 * hidden_size))             # W_ih^T, [i,f,o,g]
    w_hh = u(keys[1], (hidden_size, 4 * hidden_size))            # W_hh^T, [i,f,o,g]
    b = u(keys[2], (1, 4 * hidden_size)) + u(keys[3], (1, 4 * hidden_size))

    w_down = u(keys[4], (hidden_size, 1))
    w_med = u(keys[5], (hidden_size, 1))
    w_up = u(keys[6], (hidden_size, 1))
    b3 = u(keys[7], (1, 3))

    # Heads packed lane-dense: columns [down, med, up], remaining lanes zero.
    w_head = jnp.zeros((hidden_size, head_lanes), jnp.float32)
    w_head = (w_head.at[:, 0:1].set(w_down)
                    .at[:, 1:2].set(w_med)
                    .at[:, 2:3].set(w_up))
    b_head = jnp.zeros((1, head_lanes), jnp.float32).at[:, 0:3].set(b3)

    return {"w_ih": w_ih, "w_hh": w_hh, "b": b,
            "w_head": w_head, "b_head": b_head}


def allstm_reference(x, params):
    """Pure-JAX reference (same packed layout) for a correctness check."""
    B, T, D = x.shape
    H = params["w_hh"].shape[0]
    hp = lax.Precision.HIGHEST
    h = jnp.zeros((B, H), jnp.float32)
    c = jnp.zeros((B, H), jnp.float32)
    for t in range(T):
        gates = (jnp.dot(x[:, t, :], params["w_ih"], precision=hp)
                 + jnp.dot(h, params["w_hh"], precision=hp)
                 + params["b"])
        i_g = jax.nn.sigmoid(gates[:, 0:H])
        f_g = jax.nn.sigmoid(gates[:, H:2 * H])
        o_g = jax.nn.sigmoid(gates[:, 2 * H:3 * H])
        g_g = jnp.tanh(gates[:, 3 * H:4 * H])
        c = f_g * c + i_g * g_g
        h = o_g * jnp.tanh(c)
    out = jnp.dot(h, params["w_head"], precision=hp) + params["b_head"]
    return out[:, 0:1], out[:, 1:2], out[:, 2:3]


if __name__ == "__main__":
    # Small shapes consistent with the module's forward (scaled down from
    # input_size=30, hidden_size=256): batch=8, seq=8, input=30, hidden=128.
    # H=128 keeps every gate slice lane-aligned.
    B, T, D, H = 8, 8, 30, 128

    key = jax.random.PRNGKey(0)
    k_x, k_p = jax.random.split(key)
    x = jax.random.normal(k_x, (B, T, D), dtype=jnp.float32)
    params = init_params(k_p, D, H, output_size=1)

    down, med, up = allstm_forward(x, params)
    jax.block_until_ready((down, med, up))
    assert down.shape == (B, 1) and med.shape == (B, 1) and up.shape == (B, 1)

    d_ref, m_ref, u_ref = allstm_reference(x, params)
    # Tolerance 2e-3: the reference runs with Precision.HIGHEST while the
    # kernel uses default-precision f32 MXU matmuls; error can compound
    # slightly over the 8-step recurrence.
    for got, ref in ((down, d_ref), (med, m_ref), (up, u_ref)):
        assert float(jnp.max(jnp.abs(got - ref))) < 2e-3

    print("KERNEL_OK")
</pallas_src>

<mosaic_0001>
module attributes {stable_mosaic.version = 11 : i64} {
  func.func @allstm_kernel(%arg0: memref<8x8x30xf32, #tpu.memory_space<vmem>>, %arg1: memref<30x512xf32, #tpu.memory_space<vmem>>, %arg2: memref<128x512xf32, #tpu.memory_space<vmem>>, %arg3: memref<1x512xf32, #tpu.memory_space<vmem>>, %arg4: memref<128x128xf32, #tpu.memory_space<vmem>>, %arg5: memref<1x128xf32, #tpu.memory_space<vmem>>, %arg6: memref<8x128xf32, #tpu.memory_space<vmem>>, %arg7: memref<8x8x512xf32, #tpu.memory_space<vmem>>) attributes {dimension_semantics = [], scalar_prefetch = 0 : i64, scratch_operands = 1 : i64, tpu.core_type = #tpu.core_type<tc>} {
    %c0 = arith.constant 0 : index
    %c0_0 = arith.constant 0 : index
    %c0_1 = arith.constant 0 : index
    %0 = vector.load %arg0[%c0, %c0_0, %c0_1] : memref<8x8x30xf32, #tpu.memory_space<vmem>>, vector<8x8x30xf32>
    %1 = vector.shape_cast %0 : vector<8x8x30xf32> to vector<64x30xf32>
    %c0_2 = arith.constant 0 : index
    %c0_3 = arith.constant 0 : index
    %2 = vector.load %arg1[%c0_2, %c0_3] : memref<30x512xf32, #tpu.memory_space<vmem>>, vector<30x512xf32>
    %cst = arith.constant dense<0.000000e+00> : vector<64x512xf32>
    %3 = tpu.matmul %1, %2, %cst {dimension_numbers = #tpu.dot_dimension_numbers<[1], [0], [0], [1], [0, 0, 1, 1], [], []>} : vector<64x30xf32>, vector<30x512xf32>, vector<64x512xf32> -> vector<64x512xf32>
    %c0_4 = arith.constant 0 : index
    %c0_5 = arith.constant 0 : index
    %4 = vector.load %arg3[%c0_4, %c0_5] : memref<1x512xf32, #tpu.memory_space<vmem>>, vector<1x512xf32>
    %5 = vector.broadcast %4 : vector<1x512xf32> to vector<64x512xf32>
    %6 = arith.addf %3, %5 : vector<64x512xf32>
    %7 = vector.shape_cast %6 : vector<64x512xf32> to vector<8x8x512xf32>
    %c0_6 = arith.constant 0 : index
    %c0_7 = arith.constant 0 : index
    %c0_8 = arith.constant 0 : index
    %8 = vector.load %arg7[%c0_6, %c0_7, %c0_8] : memref<8x8x512xf32, #tpu.memory_space<vmem>>, vector<8x8x512xf32>
    tpu.vector_store %arg7[%c0_6, %c0_7, %c0_8], %7 {strides = array<i32>} : memref<8x8x512xf32, #tpu.memory_space<vmem>>, vector<8x8x512xf32>,
    %cst_9 = arith.constant 0.000000e+00 : f32
    %9 = vector.broadcast %cst_9 : f32 to vector<8x128xf32>
    %cst_10 = arith.constant 0.000000e+00 : f32
    %10 = vector.broadcast %cst_10 : f32 to vector<8x128xf32>
    %c0_i32 = arith.constant 0 : i32
    %c0_11 = arith.constant 0 : index
    %c0_12 = arith.constant 0 : index
    %11 = vector.load %arg2[%c0_11, %c0_12] : memref<128x512xf32, #tpu.memory_space<vmem>>, vector<128x512xf32>
    %cst_13 = arith.constant dense<0.000000e+00> : vector<8x512xf32>
    %12 = tpu.matmul %9, %11, %cst_13 {dimension_numbers = #tpu.dot_dimension_numbers<[1], [0], [0], [1], [0, 0, 1, 1], [], []>} : vector<8x128xf32>, vector<128x512xf32>, vector<8x512xf32> -> vector<8x512xf32>
    %13 = arith.index_cast %c0_i32 : i32 to index
    %c0_14 = arith.constant 0 : index
    %c0_15 = arith.constant 0 : index
    %14 = vector.load %arg7[%13, %c0_14, %c0_15] : memref<8x8x512xf32, #tpu.memory_space<vmem>>, vector<1x8x512xf32>
    %15 = vector.shape_cast %14 : vector<1x8x512xf32> to vector<8x512xf32>
    %16 = arith.addf %12, %15 : vector<8x512xf32>
    %17 = vector.extract_strided_slice %16 {offsets = [0, 0], sizes = [8, 384], strides = [1, 1]} : vector<8x512xf32> to vector<8x384xf32>
    %cst_16 = arith.constant 5.000000e-01 : f32
    %18 = vector.broadcast %cst_16 : f32 to vector<8x384xf32>
    %19 = arith.mulf %18, %17 : vector<8x384xf32>
    %20 = math.tanh %19 : vector<8x384xf32>
    %cst_17 = arith.constant 5.000000e-01 : f32
    %21 = vector.broadcast %cst_17 : f32 to vector<8x384xf32>
    %22 = arith.mulf %21, %20 : vector<8x384xf32>
    %cst_18 = arith.constant 5.000000e-01 : f32
    %23 = vector.broadcast %cst_18 : f32 to vector<8x384xf32>
    %24 = arith.addf %22, %23 : vector<8x384xf32>
    %25 = vector.extract_strided_slice %24 {offsets = [0, 0], sizes = [8, 128], strides = [1, 1]} : vector<8x384xf32> to vector<8x128xf32>
    %26 = vector.extract_strided_slice %24 {offsets = [0, 128], sizes = [8, 128], strides = [1, 1]} : vector<8x384xf32> to vector<8x128xf32>
    %27 = vector.extract_strided_slice %24 {offsets = [0, 256], sizes = [8, 128], strides = [1, 1]} : vector<8x384xf32> to vector<8x128xf32>
    %28 = vector.extract_strided_slice %16 {offsets = [0, 384], sizes = [8, 128], strides = [1, 1]} : vector<8x512xf32> to vector<8x128xf32>
    %29 = math.tanh %28 : vector<8x128xf32>
    %30 = arith.mulf %26, %10 : vector<8x128xf32>
    %31 = arith.mulf %25, %29 : vector<8x128xf32>
    %32 = arith.addf %30, %31 : vector<8x128xf32>
    %33 = math.tanh %32 : vector<8x128xf32>
    %34 = arith.mulf %27, %33 : vector<8x128xf32>
    %c1_i32 = arith.constant 1 : i32
    %c0_19 = arith.constant 0 : index
    %c0_20 = arith.constant 0 : index
    %35 = vector.load %arg2[%c0_19, %c0_20] : memref<128x512xf32, #tpu.memory_space<vmem>>, vector<128x512xf32>
    %cst_21 = arith.constant dense<0.000000e+00> : vector<8x512xf32>
    %36 = tpu.matmul %34, %35, %cst_21 {dimension_numbers = #tpu.dot_dimension_numbers<[1], [0], [0], [1], [0, 0, 1, 1], [], []>} : vector<8x128xf32>, vector<128x512xf32>, vector<8x512xf32> -> vector<8x512xf32>
    %37 = arith.index_cast %c1_i32 : i32 to index
    %c0_22 = arith.constant 0 : index
    %c0_23 = arith.constant 0 : index
    %38 = vector.load %arg7[%37, %c0_22, %c0_23] : memref<8x8x512xf32, #tpu.memory_space<vmem>>, vector<1x8x512xf32>
    %39 = vector.shape_cast %38 : vector<1x8x512xf32> to vector<8x512xf32>
    %40 = arith.addf %36, %39 : vector<8x512xf32>
    %41 = vector.extract_strided_slice %40 {offsets = [0, 0], sizes = [8, 384], strides = [1, 1]} : vector<8x512xf32> to vector<8x384xf32>
    %cst_24 = arith.constant 5.000000e-01 : f32
    %42 = vector.broadcast %cst_24 : f32 to vector<8x384xf32>
    %43 = arith.mulf %42, %41 : vector<8x384xf32>
    %44 = math.tanh %43 : vector<8x384xf32>
    %cst_25 = arith.constant 5.000000e-01 : f32
    %45 = vector.broadcast %cst_25 : f32 to vector<8x384xf32>
    %46 = arith.mulf %45, %44 : vector<8x384xf32>
    %cst_26 = arith.constant 5.000000e-01 : f32
    %47 = vector.broadcast %cst_26 : f32 to vector<8x384xf32>
    %48 = arith.addf %46, %47 : vector<8x384xf32>
    %49 = vector.extract_strided_slice %48 {offsets = [0, 0], sizes = [8, 128], strides = [1, 1]} : vector<8x384xf32> to vector<8x128xf32>
    %50 = vector.extract_strided_slice %48 {offsets = [0, 128], sizes = [8, 128], strides = [1, 1]} : vector<8x384xf32> to vector<8x128xf32>
    %51 = vector.extract_strided_slice %48 {offsets = [0, 256], sizes = [8, 128], strides = [1, 1]} : vector<8x384xf32> to vector<8x128xf32>
    %52 = vector.extract_strided_slice %40 {offsets = [0, 384], sizes = [8, 128], strides = [1, 1]} : vector<8x512xf32> to vector<8x128xf32>
    %53 = math.tanh %52 : vector<8x128xf32>
    %54 = arith.mulf %50, %32 : vector<8x128xf32>
    %55 = arith.mulf %49, %53 : vector<8x128xf32>
    %56 = arith.addf %54, %55 : vector<8x128xf32>
    %57 = math.tanh %56 : vector<8x128xf32>
    %58 = arith.mulf %51, %57 : vector<8x128xf32>
    %c2_i32 = arith.constant 2 : i32
    %c0_27 = arith.constant 0 : index
    %c0_28 = arith.constant 0 : index
    %59 = vector.load %arg2[%c0_27, %c0_28] : memref<128x512xf32, #tpu.memory_space<vmem>>, vector<128x512xf32>
    %cst_29 = arith.constant dense<0.000000e+00> : vector<8x512xf32>
    %60 = tpu.matmul %58, %59, %cst_29 {dimension_numbers = #tpu.dot_dimension_numbers<[1], [0], [0], [1], [0, 0, 1, 1], [], []>} : vector<8x128xf32>, vector<128x512xf32>, vector<8x512xf32> -> vector<8x512xf32>
    %61 = arith.index_cast %c2_i32 : i32 to index
    %c0_30 = arith.constant 0 : index
    %c0_31 = arith.constant 0 : index
    %62 = vector.load %arg7[%61, %c0_30, %c0_31] : memref<8x8x512xf32, #tpu.memory_space<vmem>>, vector<1x8x512xf32>
    %63 = vector.shape_cast %62 : vector<1x8x512xf32> to vector<8x512xf32>
    %64 = arith.addf %60, %63 : vector<8x512xf32>
    %65 = vector.extract_strided_slice %64 {offsets = [0, 0], sizes = [8, 384], strides = [1, 1]} : vector<8x512xf32> to vector<8x384xf32>
    %cst_32 = arith.constant 5.000000e-01 : f32
    %66 = vector.broadcast %cst_32 : f32 to vector<8x384xf32>
    %67 = arith.mulf %66, %65 : vector<8x384xf32>
    %68 = math.tanh %67 : vector<8x384xf32>
    %cst_33 = arith.constant 5.000000e-01 : f32
    %69 = vector.broadcast %cst_33 : f32 to vector<8x384xf32>
    %70 = arith.mulf %69, %68 : vector<8x384xf32>
    %cst_34 = arith.constant 5.000000e-01 : f32
    %71 = vector.broadcast %cst_34 : f32 to vector<8x384xf32>
    %72 = arith.addf %70, %71 : vector<8x384xf32>
    %73 = vector.extract_strided_slice %72 {offsets = [0, 0], sizes = [8, 128], strides = [1, 1]} : vector<8x384xf32> to vector<8x128xf32>
    %74 = vector.extract_strided_slice %72 {offsets = [0, 128], sizes = [8, 128], strides = [1, 1]} : vector<8x384xf32> to vector<8x128xf32>
    %75 = vector.extract_strided_slice %72 {offsets = [0, 256], sizes = [8, 128], strides = [1, 1]} : vector<8x384xf32> to vector<8x128xf32>
    %76 = vector.extract_strided_slice %64 {offsets = [0, 384], sizes = [8, 128], strides = [1, 1]} : vector<8x512xf32> to vector<8x128xf32>
    %77 = math.tanh %76 : vector<8x128xf32>
    %78 = arith.mulf %74, %56 : vector<8x128xf32>
    %79 = arith.mulf %73, %77 : vector<8x128xf32>
    %80 = arith.addf %78, %79 : vector<8x128xf32>
    %81 = math.tanh %80 : vector<8x128xf32>
    %82 = arith.mulf %75, %81 : vector<8x128xf32>
    %c3_i32 = arith.constant 3 : i32
    %c0_35 = arith.constant 0 : index
    %c0_36 = arith.constant 0 : index
    %83 = vector.load %arg2[%c0_35, %c0_36] : memref<128x512xf32, #tpu.memory_space<vmem>>, vector<128x512xf32>
    %cst_37 = arith.constant dense<0.000000e+00> : vector<8x512xf32>
    %84 = tpu.matmul %82, %83, %cst_37 {dimension_numbers = #tpu.dot_dimension_numbers<[1], [0], [0], [1], [0, 0, 1, 1], [], []>} : vector<8x128xf32>, vector<128x512xf32>, vector<8x512xf32> -> vector<8x512xf32>
    %85 = arith.index_cast %c3_i32 : i32 to index
    %c0_38 = arith.constant 0 : index
    %c0_39 = arith.constant 0 : index
    %86 = vector.load %arg7[%85, %c0_38, %c0_39] : memref<8x8x512xf32, #tpu.memory_space<vmem>>, vector<1x8x512xf32>
    %87 = vector.shape_cast %86 : vector<1x8x512xf32> to vector<8x512xf32>
    %88 = arith.addf %84, %87 : vector<8x512xf32>
    %89 = vector.extract_strided_slice %88 {offsets = [0, 0], sizes = [8, 384], strides = [1, 1]} : vector<8x512xf32> to vector<8x384xf32>
    %cst_40 = arith.constant 5.000000e-01 : f32
    %90 = vector.broadcast %cst_40 : f32 to vector<8x384xf32>
    %91 = arith.mulf %90, %89 : vector<8x384xf32>
    %92 = math.tanh %91 : vector<8x384xf32>
    %cst_41 = arith.constant 5.000000e-01 : f32
    %93 = vector.broadcast %cst_41 : f32 to vector<8x384xf32>
    %94 = arith.mulf %93, %92 : vector<8x384xf32>
    %cst_42 = arith.constant 5.000000e-01 : f32
    %95 = vector.broadcast %cst_42 : f32 to vector<8x384xf32>
    %96 = arith.addf %94, %95 : vector<8x384xf32>
    %97 = vector.extract_strided_slice %96 {offsets = [0, 0], sizes = [8, 128], strides = [1, 1]} : vector<8x384xf32> to vector<8x128xf32>
    %98 = vector.extract_strided_slice %96 {offsets = [0, 128], sizes = [8, 128], strides = [1, 1]} : vector<8x384xf32> to vector<8x128xf32>
    %99 = vector.extract_strided_slice %96 {offsets = [0, 256], sizes = [8, 128], strides = [1, 1]} : vector<8x384xf32> to vector<8x128xf32>
    %100 = vector.extract_strided_slice %88 {offsets = [0, 384], sizes = [8, 128], strides = [1, 1]} : vector<8x512xf32> to vector<8x128xf32>
    %101 = math.tanh %100 : vector<8x128xf32>
    %102 = arith.mulf %98, %80 : vector<8x128xf32>
    %103 = arith.mulf %97, %101 : vector<8x128xf32>
    %104 = arith.addf %102, %103 : vector<8x128xf32>
    %105 = math.tanh %104 : vector<8x128xf32>
    %106 = arith.mulf %99, %105 : vector<8x128xf32>
    %c4_i32 = arith.constant 4 : i32
    %c0_43 = arith.constant 0 : index
    %c0_44 = arith.constant 0 : index
    %107 = vector.load %arg2[%c0_43, %c0_44] : memref<128x512xf32, #tpu.memory_space<vmem>>, vector<128x512xf32>
    %cst_45 = arith.constant dense<0.000000e+00> : vector<8x512xf32>
    %108 = tpu.matmul %106, %107, %cst_45 {dimension_numbers = #tpu.dot_dimension_numbers<[1], [0], [0], [1], [0, 0, 1, 1], [], []>} : vector<8x128xf32>, vector<128x512xf32>, vector<8x512xf32> -> vector<8x512xf32>
    %109 = arith.index_cast %c4_i32 : i32 to index
    %c0_46 = arith.constant 0 : index
    %c0_47 = arith.constant 0 : index
    %110 = vector.load %arg7[%109, %c0_46, %c0_47] : memref<8x8x512xf32, #tpu.memory_space<vmem>>, vector<1x8x512xf32>
    %111 = vector.shape_cast %110 : vector<1x8x512xf32> to vector<8x512xf32>
    %112 = arith.addf %108, %111 : vector<8x512xf32>
    %113 = vector.extract_strided_slice %112 {offsets = [0, 0], sizes = [8, 384], strides = [1, 1]} : vector<8x512xf32> to vector<8x384xf32>
    %cst_48 = arith.constant 5.000000e-01 : f32
    %114 = vector.broadcast %cst_48 : f32 to vector<8x384xf32>
    %115 = arith.mulf %114, %113 : vector<8x384xf32>
    %116 = math.tanh %115 : vector<8x384xf32>
    %cst_49 = arith.constant 5.000000e-01 : f32
    %117 = vector.broadcast %cst_49 : f32 to vector<8x384xf32>
    %118 = arith.mulf %117, %116 : vector<8x384xf32>
    %cst_50 = arith.constant 5.000000e-01 : f32
    %119 = vector.broadcast %cst_50 : f32 to vector<8x384xf32>
    %120 = arith.addf %118, %119 : vector<8x384xf32>
    %121 = vector.extract_strided_slice %120 {offsets = [0, 0], sizes = [8, 128], strides = [1, 1]} : vector<8x384xf32> to vector<8x128xf32>
    %122 = vector.extract_strided_slice %120 {offsets = [0, 128], sizes = [8, 128], strides = [1, 1]} : vector<8x384xf32> to vector<8x128xf32>
    %123 = vector.extract_strided_slice %120 {offsets = [0, 256], sizes = [8, 128], strides = [1, 1]} : vector<8x384xf32> to vector<8x128xf32>
    %124 = vector.extract_strided_slice %112 {offsets = [0, 384], sizes = [8, 128], strides = [1, 1]} : vector<8x512xf32> to vector<8x128xf32>
    %125 = math.tanh %124 : vector<8x128xf32>
    %126 = arith.mulf %122, %104 : vector<8x128xf32>
    %127 = arith.mulf %121, %125 : vector<8x128xf32>
    %128 = arith.addf %126, %127 : vector<8x128xf32>
    %129 = math.tanh %128 : vector<8x128xf32>
    %130 = arith.mulf %123, %129 : vector<8x128xf32>
    %c5_i32 = arith.constant 5 : i32
    %c0_51 = arith.constant 0 : index
    %c0_52 = arith.constant 0 : index
    %131 = vector.load %arg2[%c0_51, %c0_52] : memref<128x512xf32, #tpu.memory_space<vmem>>, vector<128x512xf32>
    %cst_53 = arith.constant dense<0.000000e+00> : vector<8x512xf32>
    %132 = tpu.matmul %130, %131, %cst_53 {dimension_numbers = #tpu.dot_dimension_numbers<[1], [0], [0], [1], [0, 0, 1, 1], [], []>} : vector<8x128xf32>, vector<128x512xf32>, vector<8x512xf32> -> vector<8x512xf32>
    %133 = arith.index_cast %c5_i32 : i32 to index
    %c0_54 = arith.constant 0 : index
    %c0_55 = arith.constant 0 : index
    %134 = vector.load %arg7[%133, %c0_54, %c0_55] : memref<8x8x512xf32, #tpu.memory_space<vmem>>, vector<1x8x512xf32>
    %135 = vector.shape_cast %134 : vector<1x8x512xf32> to vector<8x512xf32>
    %136 = arith.addf %132, %135 : vector<8x512xf32>
    %137 = vector.extract_strided_slice %136 {offsets = [0, 0], sizes = [8, 384], strides = [1, 1]} : vector<8x512xf32> to vector<8x384xf32>
    %cst_56 = arith.constant 5.000000e-01 : f32
    %138 = vector.broadcast %cst_56 : f32 to vector<8x384xf32>
    %139 = arith.mulf %138, %137 : vector<8x384xf32>
    %140 = math.tanh %139 : vector<8x384xf32>
    %cst_57 = arith.constant 5.000000e-01 : f32
    %141 = vector.broadcast %cst_57 : f32 to vector<8x384xf32>
    %142 = arith.mulf %141, %140 : vector<8x384xf32>
    %cst_58 = arith.constant 5.000000e-01 : f32
    %143 = vector.broadcast %cst_58 : f32 to vector<8x384xf32>
    %144 = arith.addf %142, %143 : vector<8x384xf32>
    %145 = vector.extract_strided_slice %144 {offsets = [0, 0], sizes = [8, 128], strides = [1, 1]} : vector<8x384xf32> to vector<8x128xf32>
    %146 = vector.extract_strided_slice %144 {offsets = [0, 128], sizes = [8, 128], strides = [1, 1]} : vector<8x384xf32> to vector<8x128xf32>
    %147 = vector.extract_strided_slice %144 {offsets = [0, 256], sizes = [8, 128], strides = [1, 1]} : vector<8x384xf32> to vector<8x128xf32>
    %148 = vector.extract_strided_slice %136 {offsets = [0, 384], sizes = [8, 128], strides = [1, 1]} : vector<8x512xf32> to vector<8x128xf32>
    %149 = math.tanh %148 : vector<8x128xf32>
    %150 = arith.mulf %146, %128 : vector<8x128xf32>
    %151 = arith.mulf %145, %149 : vector<8x128xf32>
    %152 = arith.addf %150, %151 : vector<8x128xf32>
    %153 = math.tanh %152 : vector<8x128xf32>
    %154 = arith.mulf %147, %153 : vector<8x128xf32>
    %c6_i32 = arith.constant 6 : i32
    %c0_59 = arith.constant 0 : index
    %c0_60 = arith.constant 0 : index
    %155 = vector.load %arg2[%c0_59, %c0_60] : memref<128x512xf32, #tpu.memory_space<vmem>>, vector<128x512xf32>
    %cst_61 = arith.constant dense<0.000000e+00> : vector<8x512xf32>
    %156 = tpu.matmul %154, %155, %cst_61 {dimension_numbers = #tpu.dot_dimension_numbers<[1], [0], [0], [1], [0, 0, 1, 1], [], []>} : vector<8x128xf32>, vector<128x512xf32>, vector<8x512xf32> -> vector<8x512xf32>
    %157 = arith.index_cast %c6_i32 : i32 to index
    %c0_62 = arith.constant 0 : index
    %c0_63 = arith.constant 0 : index
    %158 = vector.load %arg7[%157, %c0_62, %c0_63] : memref<8x8x512xf32, #tpu.memory_space<vmem>>, vector<1x8x512xf32>
    %159 = vector.shape_cast %158 : vector<1x8x512xf32> to vector<8x512xf32>
    %160 = arith.addf %156, %159 : vector<8x512xf32>
    %161 = vector.extract_strided_slice %160 {offsets = [0, 0], sizes = [8, 384], strides = [1, 1]} : vector<8x512xf32> to vector<8x384xf32>
    %cst_64 = arith.constant 5.000000e-01 : f32
    %162 = vector.broadcast %cst_64 : f32 to vector<8x384xf32>
    %163 = arith.mulf %162, %161 : vector<8x384xf32>
    %164 = math.tanh %163 : vector<8x384xf32>
    %cst_65 = arith.constant 5.000000e-01 : f32
    %165 = vector.broadcast %cst_65 : f32 to vector<8x384xf32>
    %166 = arith.mulf %165, %164 : vector<8x384xf32>
    %cst_66 = arith.constant 5.000000e-01 : f32
    %167 = vector.broadcast %cst_66 : f32 to vector<8x384xf32>
    %168 = arith.addf %166, %167 : vector<8x384xf32>
    %169 = vector.extract_strided_slice %168 {offsets = [0, 0], sizes = [8, 128], strides = [1, 1]} : vector<8x384xf32> to vector<8x128xf32>
    %170 = vector.extract_strided_slice %168 {offsets = [0, 128], sizes = [8, 128], strides = [1, 1]} : vector<8x384xf32> to vector<8x128xf32>
    %171 = vector.extract_strided_slice %168 {offsets = [0, 256], sizes = [8, 128], strides = [1, 1]} : vector<8x384xf32> to vector<8x128xf32>
    %172 = vector.extract_strided_slice %160 {offsets = [0, 384], sizes = [8, 128], strides = [1, 1]} : vector<8x512xf32> to vector<8x128xf32>
    %173 = math.tanh %172 : vector<8x128xf32>
    %174 = arith.mulf %170, %152 : vector<8x128xf32>
    %175 = arith.mulf %169, %173 : vector<8x128xf32>
    %176 = arith.addf %174, %175 : vector<8x128xf32>
    %177 = math.tanh %176 : vector<8x128xf32>
    %178 = arith.mulf %171, %177 : vector<8x128xf32>
    %c7_i32 = arith.constant 7 : i32
    %c0_67 = arith.constant 0 : index
    %c0_68 = arith.constant 0 : index
    %179 = vector.load %arg2[%c0_67, %c0_68] : memref<128x512xf32, #tpu.memory_space<vmem>>, vector<128x512xf32>
    %cst_69 = arith.constant dense<0.000000e+00> : vector<8x512xf32>
    %180 = tpu.matmul %178, %179, %cst_69 {dimension_numbers = #tpu.dot_dimension_numbers<[1], [0], [0], [1], [0, 0, 1, 1], [], []>} : vector<8x128xf32>, vector<128x512xf32>, vector<8x512xf32> -> vector<8x512xf32>
    %181 = arith.index_cast %c7_i32 : i32 to index
    %c0_70 = arith.constant 0 : index
    %c0_71 = arith.constant 0 : index
    %182 = vector.load %arg7[%181, %c0_70, %c0_71] : memref<8x8x512xf32, #tpu.memory_space<vmem>>, vector<1x8x512xf32>
    %183 = vector.shape_cast %182 : vector<1x8x512xf32> to vector<8x512xf32>
    %184 = arith.addf %180, %183 : vector<8x512xf32>
    %185 = vector.extract_strided_slice %184 {offsets = [0, 0], sizes = [8, 384], strides = [1, 1]} : vector<8x512xf32> to vector<8x384xf32>
    %cst_72 = arith.constant 5.000000e-01 : f32
    %186 = vector.broadcast %cst_72 : f32 to vector<8x384xf32>
    %187 = arith.mulf %186, %185 : vector<8x384xf32>
    %188 = math.tanh %187 : vector<8x384xf32>
    %cst_73 = arith.constant 5.000000e-01 : f32
    %189 = vector.broadcast %cst_73 : f32 to vector<8x384xf32>
    %190 = arith.mulf %189, %188 : vector<8x384xf32>
    %cst_74 = arith.constant 5.000000e-01 : f32
    %191 = vector.broadcast %cst_74 : f32 to vector<8x384xf32>
    %192 = arith.addf %190, %191 : vector<8x384xf32>
    %193 = vector.extract_strided_slice %192 {offsets = [0, 0], sizes = [8, 128], strides = [1, 1]} : vector<8x384xf32> to vector<8x128xf32>
    %194 = vector.extract_strided_slice %192 {offsets = [0, 128], sizes = [8, 128], strides = [1, 1]} : vector<8x384xf32> to vector<8x128xf32>
    %195 = vector.extract_strided_slice %192 {offsets = [0, 256], sizes = [8, 128], strides = [1, 1]} : vector<8x384xf32> to vector<8x128xf32>
    %196 = vector.extract_strided_slice %184 {offsets = [0, 384], sizes = [8, 128], strides = [1, 1]} : vector<8x512xf32> to vector<8x128xf32>
    %197 = math.tanh %196 : vector<8x128xf32>
    %198 = arith.mulf %194, %176 : vector<8x128xf32>
    %199 = arith.mulf %193, %197 : vector<8x128xf32>
    %200 = arith.addf %198, %199 : vector<8x128xf32>
    %201 = math.tanh %200 : vector<8x128xf32>
    %202 = arith.mulf %195, %201 : vector<8x128xf32>
    %c8_i32 = arith.constant 8 : i32
    %c0_75 = arith.constant 0 : index
    %c0_76 = arith.constant 0 : index
    %203 = vector.load %arg4[%c0_75, %c0_76] : memref<128x128xf32, #tpu.memory_space<vmem>>, vector<128x128xf32>
    %cst_77 = arith.constant dense<0.000000e+00> : vector<8x128xf32>
    %204 = tpu.matmul %202, %203, %cst_77 {dimension_numbers = #tpu.dot_dimension_numbers<[1], [0], [0], [1], [0, 0, 1, 1], [], []>} : vector<8x128xf32>, vector<128x128xf32>, vector<8x128xf32> -> vector<8x128xf32>
    %c0_78 = arith.constant 0 : index
    %c0_79 = arith.constant 0 : index
    %205 = vector.load %arg5[%c0_78, %c0_79] : memref<1x128xf32, #tpu.memory_space<vmem>>, vector<1x128xf32>
    %206 = vector.broadcast %205 : vector<1x128xf32> to vector<8x128xf32>
    %207 = arith.addf %204, %206 : vector<8x128xf32>
    %c0_80 = arith.constant 0 : index
    %c0_81 = arith.constant 0 : index
    %208 = vector.load %arg6[%c0_80, %c0_81] : memref<8x128xf32, #tpu.memory_space<vmem>>, vector<8x128xf32>
    tpu.vector_store %arg6[%c0_80, %c0_81], %207 {strides = array<i32>} : memref<8x128xf32, #tpu.memory_space<vmem>>, vector<8x128xf32>,
    return
  }
}

</mosaic_0001>

<bundles_post_ra>
// kernel: tpu_custom_call.1
= control target key start
LH: loop header
LB: loop body
LE: loop exit
PB: predicated region body
PF: predicated region fallthrough
CT: control target
= control target key end

     0   :  { %11 = vsyncpa [#allocation4], 0  ;;  %s3403_s0 = inlined_call_operand.hbm [shape: f32[8,8,30], index: 0, kind: input, shape index: {}]   ;;  %s3404_s1 = inlined_call_operand.hbm [shape: f32[30,512], index: 1, kind: input, shape index: {}]   ;;  %s3405_s2 = inlined_call_operand.hbm [shape: f32[128,512], index: 2, kind: input, shape index: {}]   ;;  %s3406_s3 = inlined_call_operand.vmem [shape: f32[1,512], index: 3, kind: input, shape index: {}]   ;;  %s3407_s4 = inlined_call_operand.hbm [shape: f32[128,128], index: 4, kind: input, shape index: {}]   ;;  %s3408_s5 = inlined_call_operand.vmem [shape: f32[1,128], index: 5, kind: input, shape index: {}]   ;;  %s3409_s6 = inlined_call_operand.hbm [shape: f32[8,128], index: 6, kind: output, shape index: {}]  }
   0x1   :  { %12 = vsyncpa [#allocation7], 0 }
   0x2   :  { %13 = vsyncpa [#allocation10], 0 }
   0x3   :  { %14 = vsyncpa [#allocation5], 0  ;;  %s2819_s21 = smov [#allocation6]   ;;  %s2701_s25 = scalar_lea.hbm %s3404_s1, 2048 }
   0x4   :  { %s32_s22 = sshll.u32 %s2819_s21, 4  ;;  %p2702_p0 = scmp.ne.s32.totalorder %s3404_s1, %s2701_s25  ;;  %s33_s22 = int_to_ptr.vmem [resolvable:$true] %s32_s22 }
   0x5   :  { %p2705_p1 = scmp.lt.u32.totalorder %s2701_s25, %s3404_s1 }
   0x7   :  { %p2707_p2 = pnand %p2705_p1, %p2702_p0 }
   0x9   :  { %2710 = shalt.err (!%p2707_p2)
}
   0xa   :  { %s2711_s30 = scalar_lea.vmem %s33_s22, 2048  ;;  %p2716_p4 = scmp.lt.s32.totalorder %s33_s22, %s33_s22 }
   0xb   :  { %p2712_p3 = scmp.ne.s32.totalorder %s33_s22, %s2711_s30  ;;  %p2717_p5 = scmp.lt.s32.totalorder %s2711_s30, %s2711_s30 }
   0xd   :  { %p2718_p6 = por %p2717_p5, %p2716_p4 }
   0xf   :  { %p2719_p7 = pnand %p2718_p6, %p2712_p3 }
  0x11   :  { %2722 = shalt.err (!%p2719_p7)
}
  0x12   :  { %s2820_s7 = smov 512   ;;  %s2821_s8 = smov 32  }
  0x13   :  { %38 = dma.hbm_to_vmem [thread:$0]  %s3404_s1, 2048, %s33_s22, [#allocation7], %s2820_s7, %s2820_s7, %s2821_s8  }
  0x14   :  { %s2822_s11 = smov [#allocation3]   ;;  %s2723_s15 = scalar_lea.hbm %s3403_s0, 1024 }
  0x15   :  { %s20_s12 = sshll.u32 %s2822_s11, 4  ;;  %p2724_p8 = scmp.ne.s32.totalorder %s3403_s0, %s2723_s15  ;;  %s21_s12 = int_to_ptr.vmem [resolvable:$true] %s20_s12 }
  0x16   :  { %p2727_p9 = scmp.lt.u32.totalorder %s2723_s15, %s3403_s0 }
  0x18   :  { %p2729_p10 = pnand %p2727_p9, %p2724_p8 }
  0x1a   :  { %2732 = shalt.err (!%p2729_p10)
}
  0x1b   :  { %s2733_s20 = scalar_lea.vmem %s21_s12, 1024  ;;  %p2738_p12 = scmp.lt.s32.totalorder %s21_s12, %s21_s12 }
  0x1c   :  { %p2734_p11 = scmp.ne.s32.totalorder %s21_s12, %s2733_s20  ;;  %p2739_p13 = scmp.lt.s32.totalorder %s2733_s20, %s2733_s20 }
  0x1e   :  { %p2740_p0 = por %p2739_p13, %p2738_p12 }
  0x20   :  { %p2741_p1 = pnand %p2740_p0, %p2734_p11 }
  0x22   :  { %2744 = shalt.err (!%p2741_p1)
}
  0x23   :  { %s2823_s1 = smov 128   ;;  %s2824_s21 = smov 8  }
  0x24   :  { %26 = dma.hbm_to_vmem [thread:$0]  %s3403_s0, 1024, %s21_s12, [#allocation4], %s2823_s1, %s2823_s1, %s2824_s21  }
  0x25   :  { %s2825_s24 = smov [#allocation8]   ;;  %s2826_s26 = smov [#allocation9]  }
  0x26   :  { %s44_s25 = sshll.u32 %s2825_s24, 4  ;;  %s58_s27 = sshll.u32 %s2826_s26, 4  ;;  %s45_s25 = int_to_ptr.vmem [resolvable:$true] %s44_s25  ;;  %s2897_s27 = int_to_ptr.vmem [resolvable:$true] %s58_s27 }
  0x27   :  { %s2745_s30 = scalar_lea.hbm %s3405_s2, 8192 }
  0x28   :  { %p2746_p2 = scmp.ne.s32.totalorder %s3405_s2, %s2745_s30  ;;  %p2749_p3 = scmp.lt.u32.totalorder %s2745_s30, %s3405_s2 }
  0x2a   :  { %p2751_p4 = pnand %p2749_p3, %p2746_p2 }
  0x2c   :  { %2754 = shalt.err (!%p2751_p4)
}
  0x2d   :  { %s2755_s0 = scalar_lea.vmem %s45_s25, 8192  ;;  %p2760_p6 = scmp.lt.s32.totalorder %s45_s25, %s45_s25 }
  0x2e   :  { %p2756_p5 = scmp.ne.s32.totalorder %s45_s25, %s2755_s0  ;;  %p2761_p7 = scmp.lt.s32.totalorder %s2755_s0, %s2755_s0 }
  0x30   :  { %p2762_p8 = por %p2761_p7, %p2760_p6 }
  0x32   :  { %p2763_p9 = pnand %p2762_p8, %p2756_p5 }
  0x34   :  { %2766 = shalt.err (!%p2763_p9)
}
  0x35   :  { %50 = dma.hbm_to_vmem [thread:$0]  %s3405_s2, 8192, %s45_s25, [#allocation7], %s2820_s7, %s2820_s7, %s2821_s8  }
  0x36   :  { %s2767_s17 = scalar_lea.hbm %s3407_s4, 2048 }
  0x37   :  { %p2768_p10 = scmp.ne.s32.totalorder %s3407_s4, %s2767_s17  ;;  %p2771_p11 = scmp.lt.u32.totalorder %s2767_s17, %s3407_s4 }
  0x39   :  { %p2773_p12 = pnand %p2771_p11, %p2768_p10 }
  0x3b   :  { %2776 = shalt.err (!%p2773_p12)
}
  0x3c   :  { %s2777_s23 = scalar_lea.vmem %s2897_s27, 2048  ;;  %p2782_p0 = scmp.lt.s32.totalorder %s2897_s27, %s2897_s27 }
  0x3d   :  { %p2778_p13 = scmp.ne.s32.totalorder %s2897_s27, %s2777_s23  ;;  %p2783_p1 = scmp.lt.s32.totalorder %s2777_s23, %s2777_s23 }
  0x3f   :  { %p2784_p2 = por %p2783_p1, %p2782_p0 }
  0x41   :  { %p2785_p3 = pnand %p2784_p2, %p2778_p13 }
  0x43   :  { %2788 = shalt.err (!%p2785_p3)
}
  0x44   :  { %64 = dma.hbm_to_vmem [thread:$0]  %s3407_s4, 2048, %s2897_s27, [#allocation10], %s2823_s1, %s2823_s1, %s2824_s21  }
  0x45   :  { %2811 = dma.done.wait [#allocation4], 1024  }
  0x46   :  { %2812 = vsyncadd [#allocation4], 4294966272 }
  0x47   :  { %2813 = dma.done.wait [#allocation7], 10240  }
  0x48   :  { %2814 = vsyncadd [#allocation7], 4294957056 }
  0x49   :  { %2815 = dma.done.wait [#allocation10], 2048  }
  0x4a   :  { %2816 = vsyncadd [#allocation10], 4294965248  ;;  %v2827_v0 = vmov 0.0   ;;  %vm150_vm0 = vcmask 1045504   ;;  %vm2828_vm1 = vmmov 1   ;;  %v88_v2 = vld [vmem:[#allocation6 + $0x8] sm:$0xff] }
  0x4b   :  { %227 = vmatprep.mubr.f32.mxu0 %v2827_v0  ;;  %340 = vmatprep.mubr.f32.mxu1 %v2827_v0  ;;  %vm2936_vm2 = vmpackc.low %vm150_vm0, %vm2828_vm1  ;;  %v92_v3 = vld [vmem:[#allocation6 + $0x28] sm:$0xff]  ;;  %v90_v4 = vld [vmem:[#allocation6 + $0x18] sm:$0xff]  ;;  %vm125_vm3 = vcmask 244736   ;;  %vm2830_vm4 = vmmov 0   ;;  %s2831_s21 = smov [#allocation11]  }
  0x4c   :  { %v1988_v5 = vpack.c.bf16 %v92_v3, %v88_v2  ;;  %v94_v6 = vld [vmem:[#allocation6 + $0x38] sm:$0xff]  ;;  %v87_v7 = vld [vmem:[#allocation6] sm:$0xff]  ;;  %v89_v11 = vld [vmem:[#allocation6 + $0x10] sm:$0xff]  ;;  %s1904_s24 = sshll.u32 %s2831_s21, 4  ;;  %s1905_s24 = int_to_ptr.vmem [resolvable:$true] %s1904_s24 }
  0x4d   :  { %v91_v8 = vld [vmem:[#allocation6 + $0x20] sm:$0xff]  ;;  %v1998_v9 = vpack.c.bf16 %v94_v6, %v90_v4  ;;  %v93_v12 = vld [vmem:[#allocation6 + $0x30] sm:$0xff]  ;;  %v96_v13 = vld [vmem:[#allocation6 + $0x48] sm:$0xff]  ;;  %s2789_s25 = scalar_lea.vmem %s1905_s24, 128  ;;  %p2794_p5 = scmp.lt.s32.totalorder %s1905_s24, %s1905_s24 }
  0x4e   :  { %v1990_v10 = vpack.c.bf16 %v91_v8, %v87_v7  ;;  %1989 = vmatprep.subr.bf16.mxu0 %v1988_v5  ;;  %v2000_v14 = vpack.c.bf16 %v93_v12, %v89_v11  ;;  %v100_v15 = vld [vmem:[#allocation6 + $0x68] sm:$0x3f]  ;;  %v98_v16 = vld [vmem:[#allocation6 + $0x58] sm:$0xff]  ;;  %v95_v20 = vld [vmem:[#allocation6 + $0x40] sm:$0xff]  ;;  %p2790_p4 = scmp.ne.s32.totalorder %s1905_s24, %s2789_s25  ;;  %p2795_p6 = scmp.lt.s32.totalorder %s2789_s25, %s2789_s25 }
  0x4f   :  { %v102_v17 = vld [vmem:[#allocation6 + $0x78] sm:$0x3f]  ;;  %1999 = vmatprep.subr.bf16.mxu1 %v1998_v9  ;;  %v1992_v18 = vpack.c.bf16 %v100_v15, %v96_v13  ;;  %v99_v21 = vld [vmem:[#allocation6 + $0x60] sm:$0x3f]  ;;  %v97_v22 = vld [vmem:[#allocation6 + $0x50] sm:$0xff] }
  0x50   :  { %1991 = vmatpush1.bf16.msra.mxu0 %v1990_v10  ;;  %v2002_v19 = vpack.c.bf16 %v102_v17, %v98_v16  ;;  %2001 = vmatpush1.bf16.msra.mxu1 %v2000_v14  ;;  %v1995_v23 = vpack.c.bf16 %v99_v21, %v95_v20  ;;  %v101_v24 = vld [vmem:[#allocation6 + $0x70] sm:$0x3f]  ;;  %v422_v25 = vld [vmem:[#allocation8 + $0x8] sm:$0xff]  ;;  %v424_v28 = vld [vmem:[#allocation8 + $0x18] sm:$0xff]  ;;  %p2796_p7 = por %p2795_p6, %p2794_p5 }
  0x51   :  { %1994 = vmatprep.subr.msk.bf16.mxu0 %vm2936_vm2, %v1992_v18  ;;  %v2005_v26 = vpack.c.bf16 %v101_v24, %v97_v22  ;;  %v426_v27 = vld [vmem:[#allocation8 + $0x28] sm:$0xff]  ;;  %v428_v29 = vld [vmem:[#allocation8 + $0x38] sm:$0xff]  ;;  %v421_v32 = vld [vmem:[#allocation8] sm:$0xff] }
  0x52   :  { %2004 = vmatprep.subr.msk.bf16.mxu1 %vm2936_vm2, %v2002_v19  ;;  %v2944_v30 = vpack.c.bf16 %v426_v27, %v422_v25  ;;  %v2946_v31 = vpack.c.bf16 %v428_v29, %v424_v28  ;;  %v425_v33 = vld [vmem:[#allocation8 + $0x20] sm:$0xff]  ;;  %v423_v34 = vld [vmem:[#allocation8 + $0x10] sm:$0xff]  ;;  %v430_v38 = vld [vmem:[#allocation8 + $0x48] sm:$0xff]  ;;  %p2797_p8 = pnand %p2796_p7, %p2790_p4 }
  0x53   :  { %v79_v35 = vld [vmem:[#allocation3] sm:$0xff]  ;;  %v2950_v36 = vpack.c.bf16 %v425_v33, %v421_v32  ;;  %v427_v37 = vld [vmem:[#allocation8 + $0x30] sm:$0xff]  ;;  %v434_v40 = vld [vmem:[#allocation8 + $0x68] sm:$0xff] }
  0x54   :  { %1997 = vmatpush1.bf16.msk.msra.mxu0 %vm2936_vm2, %v1995_v23  ;;  %2007 = vmatpush1.bf16.msk.msra.mxu1 %vm2936_vm2, %v2005_v26  ;;  %v2955_v39 = vpack.c.bf16 %v427_v37, %v423_v34  ;;  %v432_v41 = vld [vmem:[#allocation8 + $0x58] sm:$0xff]  ;;  %v2958_v43 = vpack.c.bf16 %v434_v40, %v430_v38  ;;  %v429_v44 = vld [vmem:[#allocation8 + $0x40] sm:$0xff]  ;;  %v431_v46 = vld [vmem:[#allocation8 + $0x50] sm:$0xff] }
  0x55   :  { %2009 = vmatprep.subr.bf16.mxu0 %v2944_v30  ;;  %v436_v42 = vld [vmem:[#allocation8 + $0x78] sm:$0xff]  ;;  %2041 = vmatprep.subr.bf16.mxu1 %v2946_v31  ;;  %v433_v45 = vld [vmem:[#allocation8 + $0x60] sm:$0xff]  ;;  %v80_v47 = vld [vmem:[#allocation3 + $0x8] sm:$0xff] }
  0x56   :  { %v2961_v48 = vpack.c.bf16 %v436_v42, %v432_v41  ;;  %v435_v49 = vld [vmem:[#allocation8 + $0x70] sm:$0xff]  ;;  %v438_v50 = vld [vmem:[#allocation8 + $0x88] sm:$0xff]  ;;  %v2965_v51 = vpack.c.bf16 %v433_v45, %v429_v44  ;;  %v440_v53 = vld [vmem:[#allocation8 + $0x98] sm:$0xff] }
  0x57   :  { %1917 = vmatmul.mubr.msk.f32.vlgmr.msra.gmra.mrb[0].mxu0 %vm125_vm3, %v79_v35  ;;  %1927 = vmatmul.mubr.msk.f32.vlgmr.msra.gmra.mrb[0].mxu1 %vm125_vm3, %v79_v35  ;;  %v442_v52 = vld [vmem:[#allocation8 + $0xa8] sm:$0xff]  ;;  %v444_v54 = vld [vmem:[#allocation8 + $0xb8] sm:$0xff]  ;;  %v2969_v55 = vpack.c.bf16 %v435_v49, %v431_v46  ;;  %v437_v56 = vld [vmem:[#allocation8 + $0x80] sm:$0xff] }
  0x58   :  { %2011 = vmatpush1.bf16.msra.mxu0 %v2950_v36  ;;  %2043 = vmatpush1.bf16.msra.mxu1 %v2955_v39  ;;  %v441_v57 = vld [vmem:[#allocation8 + $0xa0] sm:$0xff]  ;;  %v2973_v58 = vpack.c.bf16 %v442_v52, %v438_v50  ;;  %v439_v59 = vld [vmem:[#allocation8 + $0x90] sm:$0xff]  ;;  %v2977_v61 = vpack.c.bf16 %v444_v54, %v440_v53  ;;  %v446_v62 = vld [vmem:[#allocation8 + $0xc8] sm:$0xff] }
  0x59   :  { %233 = vmatprep.mubr.f32.mxu0 %v2827_v0  ;;  %346 = vmatprep.mubr.f32.mxu1 %v2827_v0  ;;  %v443_v60 = vld [vmem:[#allocation8 + $0xb0] sm:$0xff]  ;;  %v450_v63 = vld [vmem:[#allocation8 + $0xe8] sm:$0xff]  ;;  %v2981_v2 = vpack.c.bf16 %v441_v57, %v437_v56  ;;  %v448_v3 = vld [vmem:[#allocation8 + $0xd8] sm:$0xff] }
  0x5a   :  { %2013 = vmatprep.subr.bf16.mxu0 %v2958_v43  ;;  %2045 = vmatprep.subr.bf16.mxu1 %v2961_v48  ;;  %v81_v1 = vld [vmem:[#allocation3 + $0x10] sm:$0xff]  ;;  %v452_v4 = vld [vmem:[#allocation8 + $0xf8] sm:$0xff]  ;;  %v2985_v5 = vpack.c.bf16 %v443_v60, %v439_v59  ;;  %v445_v6 = vld [vmem:[#allocation8 + $0xc0] sm:$0xff]  ;;  %v2989_v8 = vpack.c.bf16 %v450_v63, %v446_v62 }
  0x5b   :  { %1918 = vmatmul.mubr.msk.f32.gmra.mrb[2].mxu0 %vm125_vm3, %v80_v47  ;;  %1928 = vmatmul.mubr.msk.f32.gmra.mrb[2].mxu1 %vm125_vm3, %v80_v47  ;;  %v449_v7 = vld [vmem:[#allocation8 + $0xe0] sm:$0xff]  ;;  %v447_v9 = vld [vmem:[#allocation8 + $0xd0] sm:$0xff]  ;;  %v2993_v11 = vpack.c.bf16 %v452_v4, %v448_v3  ;;  %v454_v12 = vld [vmem:[#allocation8 + $0x108] sm:$0xff] }
  0x5c   :  { %2015 = vmatpush1.bf16.msra.mxu0 %v2965_v51  ;;  %2047 = vmatpush1.bf16.msra.mxu1 %v2969_v55  ;;  %v451_v10 = vld [vmem:[#allocation8 + $0xf0] sm:$0xff]  ;;  %v458_v13 = vld [vmem:[#allocation8 + $0x128] sm:$0xff]  ;;  %v82_v14 = vld [vmem:[#allocation3 + $0x18] sm:$0xff]  ;;  %v2997_v15 = vpack.c.bf16 %v449_v7, %v445_v6 }
  0x5d   :  { %239 = vmatprep.mubr.f32.mxu0 %v2827_v0  ;;  %352 = vmatprep.mubr.f32.mxu1 %v2827_v0  ;;  %v456_v16 = vld [vmem:[#allocation8 + $0x118] sm:$0xff]  ;;  %v3001_v18 = vpack.c.bf16 %v451_v10, %v447_v9  ;;  %v453_v19 = vld [vmem:[#allocation8 + $0x100] sm:$0xff]  ;;  %v3005_v21 = vpack.c.bf16 %v458_v13, %v454_v12  ;;  %v455_v22 = vld [vmem:[#allocation8 + $0x110] sm:$0xff] }
  0x5e   :  { %2017 = vmatprep.subr.bf16.mxu0 %v2973_v58  ;;  %2049 = vmatprep.subr.bf16.mxu1 %v2977_v61  ;;  %v460_v17 = vld [vmem:[#allocation8 + $0x138] sm:$0xff]  ;;  %v457_v20 = vld [vmem:[#allocation8 + $0x120] sm:$0xff]  ;;  %v459_v23 = vld [vmem:[#allocation8 + $0x130] sm:$0xff] }
  0x5f   :  { %1919 = vmatmul.mubr.msk.f32.gmra.mrb[4].mxu0 %vm125_vm3, %v81_v1  ;;  %1929 = vmatmul.mubr.msk.f32.gmra.mrb[4].mxu1 %vm125_vm3, %v81_v1  ;;  %v3009_v24 = vpack.c.bf16 %v460_v17, %v456_v16  ;;  %v462_v25 = vld [vmem:[#allocation8 + $0x148] sm:$0xff]  ;;  %v83_v27 = vld [vmem:[#allocation3 + $0x20] sm:$0xff]  ;;  %v3013_v28 = vpack.c.bf16 %v457_v20, %v453_v19  ;;  %v464_v29 = vld [vmem:[#allocation8 + $0x158] sm:$0xff]  ;;  %v3017_v33 = vpack.c.bf16 %v459_v23, %v455_v22  ;;  %v105_v20 = vlaneseq }
  0x60   :  { %2019 = vmatpush1.bf16.msra.mxu0 %v2981_v2  ;;  %2051 = vmatpush1.bf16.msra.mxu1 %v2985_v5  ;;  %v466_v26 = vld [vmem:[#allocation8 + $0x168] sm:$0xff]  ;;  %v468_v32 = vld [vmem:[#allocation8 + $0x178] sm:$0xff]  ;;  %v461_v34 = vld [vmem:[#allocation8 + $0x140] sm:$0xff] }
  0x61   :  { %245 = vmatprep.mubr.f32.mxu0 %v2827_v0  ;;  %358 = vmatprep.mubr.f32.mxu1 %v2827_v0  ;;  %v465_v35 = vld [vmem:[#allocation8 + $0x160] sm:$0xff]  ;;  %v3021_v37 = vpack.c.bf16 %v466_v26, %v462_v25  ;;  %v463_v38 = vld [vmem:[#allocation8 + $0x150] sm:$0xff]  ;;  %v3025_v41 = vpack.c.bf16 %v468_v32, %v464_v29  ;;  %v470_v42 = vld [vmem:[#allocation8 + $0x188] sm:$0xff]  ;;  %v106_v22 = vshrl.u32 %v105_v20, 7 }
  0x62   :  { %2021 = vmatprep.subr.bf16.mxu0 %v2989_v8  ;;  %2053 = vmatprep.subr.bf16.mxu1 %v2993_v11  ;;  %v467_v40 = vld [vmem:[#allocation8 + $0x170] sm:$0xff]  ;;  %v474_v44 = vld [vmem:[#allocation8 + $0x1a8] sm:$0xff]  ;;  %v3029_v46 = vpack.c.bf16 %v465_v35, %v461_v34  ;;  %v472_v47 = vld [vmem:[#allocation8 + $0x198] sm:$0xff] }
  0x63   :  { %1920 = vmatmul.mubr.msk.f32.gmra.mrb[6].mxu0 %vm125_vm3, %v82_v14  ;;  %1930 = vmatmul.mubr.msk.f32.gmra.mrb[6].mxu1 %vm125_vm3, %v82_v14  ;;  %v84_v45 = vld [vmem:[#allocation3 + $0x28] sm:$0xff]  ;;  %v476_v49 = vld [vmem:[#allocation8 + $0x1b8] sm:$0xff]  ;;  %v3033_v50 = vpack.c.bf16 %v467_v40, %v463_v38  ;;  %v469_v52 = vld [vmem:[#allocation8 + $0x180] sm:$0xff]  ;;  %v3037_v54 = vpack.c.bf16 %v474_v44, %v470_v42  ;;  %v107_v23 = vsub.s32 0, %v106_v22  ;;  %v111_v26 = vsub.s32 1, %v106_v22 }
  0x64   :  { %2023 = vmatpush1.bf16.msra.mxu0 %v2997_v15  ;;  %2055 = vmatpush1.bf16.msra.mxu1 %v3001_v18  ;;  %v473_v53 = vld [vmem:[#allocation8 + $0x1a0] sm:$0xff]  ;;  %v471_v56 = vld [vmem:[#allocation8 + $0x190] sm:$0xff]  ;;  %v3041_v59 = vpack.c.bf16 %v476_v49, %v472_v47  ;;  %v478_v60 = vld [vmem:[#allocation8 + $0x1c8] sm:$0xff]  ;;  %v119_v29 = vsub.s32 3, %v106_v22  ;;  %v115_v44 = vsub.s32 2, %v106_v22 }
  0x65   :  { %251 = vmatprep.mubr.f32.mxu0 %v2827_v0  ;;  %364 = vmatprep.mubr.f32.mxu1 %v2827_v0  ;;  %v475_v57 = vld [vmem:[#allocation8 + $0x1b0] sm:$0xff]  ;;  %v482_v62 = vld [vmem:[#allocation8 + $0x1e8] sm:$0xff]  ;;  %v3045_v1 = vpack.c.bf16 %v473_v53, %v469_v52  ;;  %v480_v3 = vld [vmem:[#allocation8 + $0x1d8] sm:$0xff] }
  0x66   :  { %2025 = vmatprep.subr.bf16.mxu0 %v3005_v21  ;;  %2057 = vmatprep.subr.bf16.mxu1 %v3009_v24  ;;  %v85_v63 = vld [vmem:[#allocation3 + $0x30] sm:$0xff]  ;;  %v484_v4 = vld [vmem:[#allocation8 + $0x1f8] sm:$0xff]  ;;  %v3049_v6 = vpack.c.bf16 %v475_v57, %v471_v56  ;;  %v477_v7 = vld [vmem:[#allocation8 + $0x1c0] sm:$0xff]  ;;  %v3053_v10 = vpack.c.bf16 %v482_v62, %v478_v60 }
  0x67   :  { %1921 = vmatmul.mubr.msk.f32.gmra.mrb[8].mxu0 %vm125_vm3, %v83_v27  ;;  %1931 = vmatmul.mubr.msk.f32.gmra.mrb[8].mxu1 %vm125_vm3, %v83_v27  ;;  %v481_v9 = vld [vmem:[#allocation8 + $0x1e0] sm:$0xff]  ;;  %v479_v12 = vld [vmem:[#allocation8 + $0x1d0] sm:$0xff]  ;;  %v3057_v14 = vpack.c.bf16 %v484_v4, %v480_v3  ;;  %v86_v16 = vld [vmem:[#allocation3 + $0x38] sm:$0xff] }
  0x68   :  { %2027 = vmatpush1.bf16.msra.mxu0 %v3013_v28  ;;  %2059 = vmatpush1.bf16.msra.mxu1 %v3017_v33  ;;  %v483_v13 = vld [vmem:[#allocation8 + $0x1f0] sm:$0xff]  ;;  %v3061_v17 = vpack.c.bf16 %v481_v9, %v477_v7  ;;  %v103_v25 = vld [vmem:[%s3406_s3] sm:$0xf] }
  0x69   :  { %257 = vmatprep.mubr.f32.mxu0 %v2827_v0  ;;  %370 = vmatprep.mubr.f32.mxu1 %v2827_v0  ;;  %v3065_v19 = vpack.c.bf16 %v483_v13, %v479_v12  ;;  %v3117_v27 = vrot.slane %v103_v25, %v107_v23  ;;  %v3119_v32 = vrot.slane %v103_v25, %v111_v26 }
  0x6a   :  { %2029 = vmatprep.subr.bf16.mxu0 %v3021_v37  ;;  %2061 = vmatprep.subr.bf16.mxu1 %v3025_v41  ;;  %v3122_v42 = vrot.slane %v103_v25, %v119_v29  ;;  %v3126_v56 = vrot.slane %v103_v25, %v115_v44 }
  0x6b   :  { %1922 = vmatmul.mubr.msk.f32.gmra.mrb[10].mxu0 %vm125_vm3, %v84_v45  ;;  %1932 = vmatmul.mubr.msk.f32.gmra.mrb[10].mxu1 %vm125_vm3, %v84_v45 }
  0x6c   :  { %2031 = vmatpush1.bf16.msra.mxu0 %v3029_v46  ;;  %2063 = vmatpush1.bf16.msra.mxu1 %v3033_v50 }
  0x6d   :  { %263 = vmatprep.mubr.f32.mxu0 %v2827_v0  ;;  %376 = vmatprep.mubr.f32.mxu1 %v2827_v0 }
  0x6e   :  { %2033 = vmatprep.subr.bf16.mxu0 %v3037_v54  ;;  %2065 = vmatprep.subr.bf16.mxu1 %v3041_v59 }
  0x6f   :  { %1923 = vmatmul.mubr.msk.f32.gmra.mrb[12].mxu0 %vm125_vm3, %v85_v63  ;;  %1933 = vmatmul.mubr.msk.f32.gmra.mrb[12].mxu1 %vm125_vm3, %v85_v63 }
  0x70   :  { %2035 = vmatpush1.bf16.msra.mxu0 %v3045_v1  ;;  %2067 = vmatpush1.bf16.msra.mxu1 %v3049_v6 }
  0x71   :  { %269 = vmatprep.mubr.f32.mxu0 %v2827_v0  ;;  %382 = vmatprep.mubr.f32.mxu1 %v2827_v0 }
  0x72   :  { %2037 = vmatprep.subr.bf16.mxu0 %v3053_v10  ;;  %2069 = vmatprep.subr.bf16.mxu1 %v3057_v14 }
  0x73   :  { %1924 = vmatmul.mubr.msk.f32.gmra.mrb[14].mxu0 %vm125_vm3, %v86_v16  ;;  %1934 = vmatmul.mubr.msk.f32.gmra.mrb[14].mxu1 %vm125_vm3, %v86_v16 }
  0x74   :  { %2039 = vmatpush1.bf16.msra.mxu0 %v3061_v17  ;;  %2071 = vmatpush1.bf16.msra.mxu1 %v3065_v19 }
  0x75   :  { %553 = vmatprep.mubr.f32.mxu0 %v2827_v0  ;;  %624 = vmatprep.mubr.f32.mxu1 %v2827_v0 }
  0x76   :  { %2073 = vmatprep.subr.bf16.mxu0 %v2944_v30  ;;  %2105 = vmatprep.subr.bf16.mxu1 %v2946_v31 }
  0x77   :  { %554 = vmatmul.mubr.f32.vlgmr.msra.gmra.mrb[0].mxu0 %v2827_v0  ;;  %625 = vmatmul.mubr.f32.vlgmr.msra.gmra.mrb[0].mxu1 %v2827_v0 }
  0x78   :  { %2075 = vmatpush1.bf16.msra.mxu0 %v2950_v36  ;;  %2107 = vmatpush1.bf16.msra.mxu1 %v2955_v39 }
  0x79   :  { %2077 = vmatprep.subr.bf16.mxu0 %v2958_v43  ;;  %2109 = vmatprep.subr.bf16.mxu1 %v2961_v48 }
  0x7a   :  { %718 = vmatprep.mubr.f32.mxu0 %v2827_v0  ;;  %789 = vmatprep.mubr.f32.mxu1 %v2827_v0 }
  0x7c   :  { %2079 = vmatpush1.bf16.msra.mxu0 %v2965_v51  ;;  %2111 = vmatpush1.bf16.msra.mxu1 %v2969_v55 }
  0x7d   :  { %2081 = vmatprep.subr.bf16.mxu0 %v2973_v58  ;;  %2113 = vmatprep.subr.bf16.mxu1 %v2977_v61 }
  0x80   :  { %2083 = vmatpush1.bf16.msra.mxu0 %v2981_v2  ;;  %2115 = vmatpush1.bf16.msra.mxu1 %v2985_v5 }
  0x81   :  { %2085 = vmatprep.subr.bf16.mxu0 %v2989_v8  ;;  %2117 = vmatprep.subr.bf16.mxu1 %v2993_v11 }
  0x84   :  { %2087 = vmatpush1.bf16.msra.mxu0 %v2997_v15  ;;  %2119 = vmatpush1.bf16.msra.mxu1 %v3001_v18 }
  0x85   :  { %2089 = vmatprep.subr.bf16.mxu0 %v3005_v21  ;;  %2121 = vmatprep.subr.bf16.mxu1 %v3009_v24 }
  0x88   :  { %2091 = vmatpush1.bf16.msra.mxu0 %v3013_v28  ;;  %2123 = vmatpush1.bf16.msra.mxu1 %v3017_v33 }
  0x89   :  { %2093 = vmatprep.subr.bf16.mxu0 %v3021_v37  ;;  %2125 = vmatprep.subr.bf16.mxu1 %v3025_v41 }
  0x8c   :  { %2095 = vmatpush1.bf16.msra.mxu0 %v3029_v46  ;;  %2127 = vmatpush1.bf16.msra.mxu1 %v3033_v50 }
  0x8d   :  { %2097 = vmatprep.subr.bf16.mxu0 %v3037_v54  ;;  %2129 = vmatprep.subr.bf16.mxu1 %v3041_v59 }
  0x90   :  { %2099 = vmatpush1.bf16.msra.mxu0 %v3045_v1  ;;  %2131 = vmatpush1.bf16.msra.mxu1 %v3049_v6 }
  0x91   :  { %2101 = vmatprep.subr.bf16.mxu0 %v3053_v10  ;;  %2133 = vmatprep.subr.bf16.mxu1 %v3057_v14 }
  0x94   :  { %2103 = vmatpush1.bf16.msra.mxu0 %v3061_v17  ;;  %2135 = vmatpush1.bf16.msra.mxu1 %v3065_v19 }
  0x95   :  { %2137 = vmatprep.subr.bf16.mxu0 %v2944_v30  ;;  %2169 = vmatprep.subr.bf16.mxu1 %v2946_v31 }
 0x14a   :  { %v555_v34 = vpop.f32.mrb[0].mxu0  ;;  %v626_v38 = vpop.f32.mrb[0].mxu1 }
 0x14b   :  { %v2544_v35 = vadd.f32 %v555_v34, %v3117_v27  ;;  %v557_v40 = vpop.f32.mrb[1].mxu0  ;;  %v628_v47 = vpop.f32.mrb[1].mxu1  ;;  %v2560_v57 = vadd.f32 %v626_v38, %v3126_v56 }
 0x14c   :  { %v2545_v45 = vadd.f32 %v557_v40, %v3119_v32  ;;  %v2561_v53 = vadd.f32 %v628_v47, %v3122_v42 }
 0x14d   :  { %v631_v49 = vmul.f32 0.5, %v2544_v35  ;;  %v633_v60 = vmul.f32 0.5, %v2560_v57 }
 0x14e   :  { %v632_v52 = vmul.f32 0.5, %v2545_v45 }
 0x14f   :  { %2621 = vtanh.f32 %v631_v49 }
 0x150   :  { %2623 = vtanh.f32 %v632_v52 }
 0x151   :  { %2625 = vtanh.f32 %v2561_v53 }
 0x152   :  { %2627 = vtanh.f32 %v633_v60 }
 0x159   :  { %v2622_v62 = vpop.eup %2621 }
 0x15a   :  { %v637_v63 = vmul.f32 0.5, %v2622_v62  ;;  %v2624_v3 = vpop.eup %2623 }
 0x15b   :  { %v638_v7 = vmul.f32 0.5, %v2624_v3  ;;  %v2626_v9 = vpop.eup %2625 }
 0x15c   :  { %v640_v4 = vadd.f32 0.5, %v637_v63  ;;  %v2628_v22 = vpop.eup %2627 }
 0x15d   :  { %v641_v12 = vadd.f32 0.5, %v638_v7  ;;  %v639_v23 = vmul.f32 0.5, %v2628_v22 }
 0x15e   :  { %v645_v13 = vmul.f32 %v2626_v9, %v640_v4 }
 0x15f   :  { %v644_v16 = vmul.f32 0.0, %v641_v12  ;;  %v642_v25 = vadd.f32 0.5, %v639_v23 }
 0x161   :  { %v3129_v20 = vadd.f32 %v645_v13, %v644_v16 }
 0x163   :  { %2629 = vtanh.f32 %v3129_v20 }
 0x16d   :  { %v2630_v26 = vpop.eup %2629 }
 0x16e   :  { %v648_v29 = vmul.f32 %v2630_v26, %v642_v25 }
 0x170   :  { %719 = vmatmul.mubr.f32.vlgmr.msra.gmra.mrb[2].mxu0 %v648_v29  ;;  %790 = vmatmul.mubr.f32.vlgmr.msra.gmra.mrb[2].mxu1 %v648_v29 }
 0x171   :  { %2139 = vmatpush1.bf16.msra.mxu0 %v2950_v36  ;;  %2171 = vmatpush1.bf16.msra.mxu1 %v2955_v39 }
 0x172   :  { %2141 = vmatprep.subr.bf16.mxu0 %v2958_v43  ;;  %2173 = vmatprep.subr.bf16.mxu1 %v2961_v48 }
 0x173   :  { %883 = vmatprep.mubr.f32.mxu0 %v2827_v0  ;;  %954 = vmatprep.mubr.f32.mxu1 %v2827_v0 }
 0x175   :  { %2143 = vmatpush1.bf16.msra.mxu0 %v2965_v51  ;;  %2175 = vmatpush1.bf16.msra.mxu1 %v2969_v55 }
 0x176   :  { %2145 = vmatprep.subr.bf16.mxu0 %v2973_v58  ;;  %2177 = vmatprep.subr.bf16.mxu1 %v2977_v61 }
 0x179   :  { %2147 = vmatpush1.bf16.msra.mxu0 %v2981_v2  ;;  %2179 = vmatpush1.bf16.msra.mxu1 %v2985_v5 }
 0x17a   :  { %2149 = vmatprep.subr.bf16.mxu0 %v2989_v8  ;;  %2181 = vmatprep.subr.bf16.mxu1 %v2993_v11 }
 0x17d   :  { %2151 = vmatpush1.bf16.msra.mxu0 %v2997_v15  ;;  %2183 = vmatpush1.bf16.msra.mxu1 %v3001_v18 }
 0x17e   :  { %2153 = vmatprep.subr.bf16.mxu0 %v3005_v21  ;;  %2185 = vmatprep.subr.bf16.mxu1 %v3009_v24 }
 0x181   :  { %2155 = vmatpush1.bf16.msra.mxu0 %v3013_v28  ;;  %2187 = vmatpush1.bf16.msra.mxu1 %v3017_v33 }
 0x182   :  { %2157 = vmatprep.subr.bf16.mxu0 %v3021_v37  ;;  %2189 = vmatprep.subr.bf16.mxu1 %v3025_v41 }
 0x185   :  { %2159 = vmatpush1.bf16.msra.mxu0 %v3029_v46  ;;  %2191 = vmatpush1.bf16.msra.mxu1 %v3033_v50 }
 0x186   :  { %2161 = vmatprep.subr.bf16.mxu0 %v3037_v54  ;;  %2193 = vmatprep.subr.bf16.mxu1 %v3041_v59 }
 0x189   :  { %2163 = vmatpush1.bf16.msra.mxu0 %v3045_v1  ;;  %2195 = vmatpush1.bf16.msra.mxu1 %v3049_v6 }
 0x18a   :  { %2165 = vmatprep.subr.bf16.mxu0 %v3053_v10  ;;  %2197 = vmatprep.subr.bf16.mxu1 %v3057_v14 }
 0x18d   :  { %2167 = vmatpush1.bf16.msra.mxu0 %v3061_v17  ;;  %2199 = vmatpush1.bf16.msra.mxu1 %v3065_v19 }
 0x18e   :  { %2201 = vmatprep.subr.bf16.mxu0 %v2944_v30  ;;  %2233 = vmatprep.subr.bf16.mxu1 %v2946_v31 }
 0x243   :  { %v720_v34 = vpop.f32.mrb[2].mxu0  ;;  %v791_v35 = vpop.f32.mrb[2].mxu1 }
 0x244   :  { %v2546_v38 = vadd.f32 %v720_v34, %v3117_v27  ;;  %v722_v40 = vpop.f32.mrb[3].mxu0  ;;  %v793_v44 = vpop.f32.mrb[3].mxu1  ;;  %v2562_v53 = vadd.f32 %v791_v35, %v3126_v56 }
 0x245   :  { %v2547_v45 = vadd.f32 %v722_v40, %v3119_v32  ;;  %v2563_v52 = vadd.f32 %v793_v44, %v3122_v42 }
 0x246   :  { %v796_v47 = vmul.f32 0.5, %v2546_v38  ;;  %v798_v57 = vmul.f32 0.5, %v2562_v53 }
 0x247   :  { %v797_v49 = vmul.f32 0.5, %v2547_v45 }
 0x248   :  { %2631 = vtanh.f32 %v796_v47 }
 0x249   :  { %2633 = vtanh.f32 %v797_v49 }
 0x24a   :  { %2635 = vtanh.f32 %v2563_v52 }
 0x24b   :  { %2637 = vtanh.f32 %v798_v57 }
 0x252   :  { %v2632_v60 = vpop.eup %2631 }
 0x253   :  { %v802_v62 = vmul.f32 0.5, %v2632_v60  ;;  %v2634_v63 = vpop.eup %2633 }
 0x254   :  { %v803_v4 = vmul.f32 0.5, %v2634_v63  ;;  %v2636_v7 = vpop.eup %2635 }
 0x255   :  { %v805_v3 = vadd.f32 0.5, %v802_v62  ;;  %v2638_v22 = vpop.eup %2637 }
 0x256   :  { %v806_v9 = vadd.f32 0.5, %v803_v4  ;;  %v804_v23 = vmul.f32 0.5, %v2638_v22 }
 0x257   :  { %v810_v12 = vmul.f32 %v2636_v7, %v805_v3 }
 0x258   :  { %v809_v13 = vmul.f32 %v806_v9, %v3129_v20  ;;  %v807_v25 = vadd.f32 0.5, %v804_v23 }
 0x25a   :  { %v3171_v16 = vadd.f32 %v810_v12, %v809_v13 }
 0x25c   :  { %2639 = vtanh.f32 %v3171_v16 }
 0x266   :  { %v2640_v26 = vpop.eup %2639 }
 0x267   :  { %v813_v29 = vmul.f32 %v2640_v26, %v807_v25 }
 0x269   :  { %884 = vmatmul.mubr.f32.vlgmr.msra.gmra.mrb[4].mxu0 %v813_v29  ;;  %955 = vmatmul.mubr.f32.vlgmr.msra.gmra.mrb[4].mxu1 %v813_v29 }
 0x26a   :  { %2203 = vmatpush1.bf16.msra.mxu0 %v2950_v36  ;;  %2235 = vmatpush1.bf16.msra.mxu1 %v2955_v39 }
 0x26b   :  { %2205 = vmatprep.subr.bf16.mxu0 %v2958_v43  ;;  %2237 = vmatprep.subr.bf16.mxu1 %v2961_v48 }
 0x26c   :  { %1048 = vmatprep.mubr.f32.mxu0 %v2827_v0  ;;  %1119 = vmatprep.mubr.f32.mxu1 %v2827_v0 }
 0x26e   :  { %2207 = vmatpush1.bf16.msra.mxu0 %v2965_v51  ;;  %2239 = vmatpush1.bf16.msra.mxu1 %v2969_v55 }
 0x26f   :  { %2209 = vmatprep.subr.bf16.mxu0 %v2973_v58  ;;  %2241 = vmatprep.subr.bf16.mxu1 %v2977_v61 }
 0x272   :  { %2211 = vmatpush1.bf16.msra.mxu0 %v2981_v2  ;;  %2243 = vmatpush1.bf16.msra.mxu1 %v2985_v5 }
 0x273   :  { %2213 = vmatprep.subr.bf16.mxu0 %v2989_v8  ;;  %2245 = vmatprep.subr.bf16.mxu1 %v2993_v11 }
 0x276   :  { %2215 = vmatpush1.bf16.msra.mxu0 %v2997_v15  ;;  %2247 = vmatpush1.bf16.msra.mxu1 %v3001_v18 }
 0x277   :  { %2217 = vmatprep.subr.bf16.mxu0 %v3005_v21  ;;  %2249 = vmatprep.subr.bf16.mxu1 %v3009_v24 }
 0x27a   :  { %2219 = vmatpush1.bf16.msra.mxu0 %v3013_v28  ;;  %2251 = vmatpush1.bf16.msra.mxu1 %v3017_v33 }
 0x27b   :  { %2221 = vmatprep.subr.bf16.mxu0 %v3021_v37  ;;  %2253 = vmatprep.subr.bf16.mxu1 %v3025_v41 }
 0x27e   :  { %2223 = vmatpush1.bf16.msra.mxu0 %v3029_v46  ;;  %2255 = vmatpush1.bf16.msra.mxu1 %v3033_v50 }
 0x27f   :  { %2225 = vmatprep.subr.bf16.mxu0 %v3037_v54  ;;  %2257 = vmatprep.subr.bf16.mxu1 %v3041_v59 }
 0x282   :  { %2227 = vmatpush1.bf16.msra.mxu0 %v3045_v1  ;;  %2259 = vmatpush1.bf16.msra.mxu1 %v3049_v6 }
 0x283   :  { %2229 = vmatprep.subr.bf16.mxu0 %v3053_v10  ;;  %2261 = vmatprep.subr.bf16.mxu1 %v3057_v14 }
 0x286   :  { %2231 = vmatpush1.bf16.msra.mxu0 %v3061_v17  ;;  %2263 = vmatpush1.bf16.msra.mxu1 %v3065_v19 }
 0x287   :  { %2265 = vmatprep.subr.bf16.mxu0 %v2944_v30  ;;  %2297 = vmatprep.subr.bf16.mxu1 %v2946_v31 }
 0x33c   :  { %v885_v20 = vpop.f32.mrb[4].mxu0  ;;  %v956_v34 = vpop.f32.mrb[4].mxu1 }
 0x33d   :  { %v2548_v35 = vadd.f32 %v885_v20, %v3117_v27  ;;  %v887_v38 = vpop.f32.mrb[5].mxu0  ;;  %v958_v40 = vpop.f32.mrb[5].mxu1  ;;  %v2564_v52 = vadd.f32 %v956_v34, %v3126_v56 }
 0x33e   :  { %v2549_v44 = vadd.f32 %v887_v38, %v3119_v32  ;;  %v2565_v49 = vadd.f32 %v958_v40, %v3122_v42 }
 0x33f   :  { %v961_v45 = vmul.f32 0.5, %v2548_v35  ;;  %v963_v53 = vmul.f32 0.5, %v2564_v52 }
 0x340   :  { %v962_v47 = vmul.f32 0.5, %v2549_v44 }
 0x341   :  { %2641 = vtanh.f32 %v961_v45 }
 0x342   :  { %2643 = vtanh.f32 %v962_v47 }
 0x343   :  { %2645 = vtanh.f32 %v2565_v49 }
 0x344   :  { %2647 = vtanh.f32 %v963_v53 }
 0x34b   :  { %v2642_v57 = vpop.eup %2641 }
 0x34c   :  { %v967_v60 = vmul.f32 0.5, %v2642_v57  ;;  %v2644_v62 = vpop.eup %2643 }
 0x34d   :  { %v968_v3 = vmul.f32 0.5, %v2644_v62  ;;  %v2646_v4 = vpop.eup %2645 }
 0x34e   :  { %v970_v63 = vadd.f32 0.5, %v967_v60  ;;  %v2648_v22 = vpop.eup %2647 }
 0x34f   :  { %v971_v7 = vadd.f32 0.5, %v968_v3  ;;  %v969_v23 = vmul.f32 0.5, %v2648_v22 }
 0x350   :  { %v975_v9 = vmul.f32 %v2646_v4, %v970_v63 }
 0x351   :  { %v974_v12 = vmul.f32 %v971_v7, %v3171_v16  ;;  %v972_v25 = vadd.f32 0.5, %v969_v23 }
 0x353   :  { %v3213_v13 = vadd.f32 %v975_v9, %v974_v12 }
 0x355   :  { %2649 = vtanh.f32 %v3213_v13 }
 0x35f   :  { %v2650_v26 = vpop.eup %2649 }
 0x360   :  { %v978_v29 = vmul.f32 %v2650_v26, %v972_v25 }
 0x362   :  { %1049 = vmatmul.mubr.f32.vlgmr.msra.gmra.mrb[6].mxu0 %v978_v29  ;;  %1120 = vmatmul.mubr.f32.vlgmr.msra.gmra.mrb[6].mxu1 %v978_v29 }
 0x363   :  { %2267 = vmatpush1.bf16.msra.mxu0 %v2950_v36  ;;  %2299 = vmatpush1.bf16.msra.mxu1 %v2955_v39 }
 0x364   :  { %2269 = vmatprep.subr.bf16.mxu0 %v2958_v43  ;;  %2301 = vmatprep.subr.bf16.mxu1 %v2961_v48 }
 0x365   :  { %1213 = vmatprep.mubr.f32.mxu0 %v2827_v0  ;;  %1284 = vmatprep.mubr.f32.mxu1 %v2827_v0 }
 0x367   :  { %2271 = vmatpush1.bf16.msra.mxu0 %v2965_v51  ;;  %2303 = vmatpush1.bf16.msra.mxu1 %v2969_v55 }
 0x368   :  { %2273 = vmatprep.subr.bf16.mxu0 %v2973_v58  ;;  %2305 = vmatprep.subr.bf16.mxu1 %v2977_v61 }
 0x36b   :  { %2275 = vmatpush1.bf16.msra.mxu0 %v2981_v2  ;;  %2307 = vmatpush1.bf16.msra.mxu1 %v2985_v5 }
 0x36c   :  { %2277 = vmatprep.subr.bf16.mxu0 %v2989_v8  ;;  %2309 = vmatprep.subr.bf16.mxu1 %v2993_v11 }
 0x36f   :  { %2279 = vmatpush1.bf16.msra.mxu0 %v2997_v15  ;;  %2311 = vmatpush1.bf16.msra.mxu1 %v3001_v18 }
 0x370   :  { %2281 = vmatprep.subr.bf16.mxu0 %v3005_v21  ;;  %2313 = vmatprep.subr.bf16.mxu1 %v3009_v24 }
 0x373   :  { %2283 = vmatpush1.bf16.msra.mxu0 %v3013_v28  ;;  %2315 = vmatpush1.bf16.msra.mxu1 %v3017_v33 }
 0x374   :  { %2285 = vmatprep.subr.bf16.mxu0 %v3021_v37  ;;  %2317 = vmatprep.subr.bf16.mxu1 %v3025_v41 }
 0x377   :  { %2287 = vmatpush1.bf16.msra.mxu0 %v3029_v46  ;;  %2319 = vmatpush1.bf16.msra.mxu1 %v3033_v50 }
 0x378   :  { %2289 = vmatprep.subr.bf16.mxu0 %v3037_v54  ;;  %2321 = vmatprep.subr.bf16.mxu1 %v3041_v59 }
 0x37b   :  { %2291 = vmatpush1.bf16.msra.mxu0 %v3045_v1  ;;  %2323 = vmatpush1.bf16.msra.mxu1 %v3049_v6 }
 0x37c   :  { %2293 = vmatprep.subr.bf16.mxu0 %v3053_v10  ;;  %2325 = vmatprep.subr.bf16.mxu1 %v3057_v14 }
 0x37f   :  { %2295 = vmatpush1.bf16.msra.mxu0 %v3061_v17  ;;  %2327 = vmatpush1.bf16.msra.mxu1 %v3065_v19 }
 0x380   :  { %2329 = vmatprep.subr.bf16.mxu0 %v2944_v30  ;;  %2361 = vmatprep.subr.bf16.mxu1 %v2946_v31 }
 0x435   :  { %v1050_v16 = vpop.f32.mrb[6].mxu0  ;;  %v1121_v20 = vpop.f32.mrb[6].mxu1 }
 0x436   :  { %v2550_v34 = vadd.f32 %v1050_v16, %v3117_v27  ;;  %v1052_v35 = vpop.f32.mrb[7].mxu0  ;;  %v1123_v38 = vpop.f32.mrb[7].mxu1  ;;  %v2566_v49 = vadd.f32 %v1121_v20, %v3126_v56 }
 0x437   :  { %v2551_v40 = vadd.f32 %v1052_v35, %v3119_v32  ;;  %v2567_v47 = vadd.f32 %v1123_v38, %v3122_v42 }
 0x438   :  { %v1126_v44 = vmul.f32 0.5, %v2550_v34  ;;  %v1128_v52 = vmul.f32 0.5, %v2566_v49 }
 0x439   :  { %v1127_v45 = vmul.f32 0.5, %v2551_v40 }
 0x43a   :  { %2651 = vtanh.f32 %v1126_v44 }
 0x43b   :  { %2653 = vtanh.f32 %v1127_v45 }
 0x43c   :  { %2655 = vtanh.f32 %v2567_v47 }
 0x43d   :  { %2657 = vtanh.f32 %v1128_v52 }
 0x444   :  { %v2652_v53 = vpop.eup %2651 }
 0x445   :  { %v1132_v57 = vmul.f32 0.5, %v2652_v53  ;;  %v2654_v60 = vpop.eup %2653 }
 0x446   :  { %v1133_v63 = vmul.f32 0.5, %v2654_v60  ;;  %v2656_v3 = vpop.eup %2655 }
 0x447   :  { %v1135_v62 = vadd.f32 0.5, %v1132_v57  ;;  %v2658_v22 = vpop.eup %2657 }
 0x448   :  { %v1136_v4 = vadd.f32 0.5, %v1133_v63  ;;  %v1134_v23 = vmul.f32 0.5, %v2658_v22 }
 0x449   :  { %v1140_v7 = vmul.f32 %v2656_v3, %v1135_v62 }
 0x44a   :  { %v1139_v9 = vmul.f32 %v1136_v4, %v3213_v13  ;;  %v1137_v25 = vadd.f32 0.5, %v1134_v23 }
 0x44c   :  { %v3255_v12 = vadd.f32 %v1140_v7, %v1139_v9 }
 0x44e   :  { %2659 = vtanh.f32 %v3255_v12 }
 0x458   :  { %v2660_v26 = vpop.eup %2659 }
 0x459   :  { %v1143_v29 = vmul.f32 %v2660_v26, %v1137_v25 }
 0x45b   :  { %1214 = vmatmul.mubr.f32.vlgmr.msra.gmra.mrb[8].mxu0 %v1143_v29  ;;  %1285 = vmatmul.mubr.f32.vlgmr.msra.gmra.mrb[8].mxu1 %v1143_v29 }
 0x45c   :  { %2331 = vmatpush1.bf16.msra.mxu0 %v2950_v36  ;;  %2363 = vmatpush1.bf16.msra.mxu1 %v2955_v39 }
 0x45d   :  { %2333 = vmatprep.subr.bf16.mxu0 %v2958_v43  ;;  %2365 = vmatprep.subr.bf16.mxu1 %v2961_v48 }
 0x45e   :  { %1378 = vmatprep.mubr.f32.mxu0 %v2827_v0  ;;  %1449 = vmatprep.mubr.f32.mxu1 %v2827_v0 }
 0x460   :  { %2335 = vmatpush1.bf16.msra.mxu0 %v2965_v51  ;;  %2367 = vmatpush1.bf16.msra.mxu1 %v2969_v55 }
 0x461   :  { %2337 = vmatprep.subr.bf16.mxu0 %v2973_v58  ;;  %2369 = vmatprep.subr.bf16.mxu1 %v2977_v61 }
 0x464   :  { %2339 = vmatpush1.bf16.msra.mxu0 %v2981_v2  ;;  %2371 = vmatpush1.bf16.msra.mxu1 %v2985_v5 }
 0x465   :  { %2341 = vmatprep.subr.bf16.mxu0 %v2989_v8  ;;  %2373 = vmatprep.subr.bf16.mxu1 %v2993_v11 }
 0x468   :  { %2343 = vmatpush1.bf16.msra.mxu0 %v2997_v15  ;;  %2375 = vmatpush1.bf16.msra.mxu1 %v3001_v18 }
 0x469   :  { %2345 = vmatprep.subr.bf16.mxu0 %v3005_v21  ;;  %2377 = vmatprep.subr.bf16.mxu1 %v3009_v24 }
 0x46c   :  { %2347 = vmatpush1.bf16.msra.mxu0 %v3013_v28  ;;  %2379 = vmatpush1.bf16.msra.mxu1 %v3017_v33 }
 0x46d   :  { %2349 = vmatprep.subr.bf16.mxu0 %v3021_v37  ;;  %2381 = vmatprep.subr.bf16.mxu1 %v3025_v41 }
 0x470   :  { %2351 = vmatpush1.bf16.msra.mxu0 %v3029_v46  ;;  %2383 = vmatpush1.bf16.msra.mxu1 %v3033_v50 }
 0x471   :  { %2353 = vmatprep.subr.bf16.mxu0 %v3037_v54  ;;  %2385 = vmatprep.subr.bf16.mxu1 %v3041_v59 }
 0x474   :  { %2355 = vmatpush1.bf16.msra.mxu0 %v3045_v1  ;;  %2387 = vmatpush1.bf16.msra.mxu1 %v3049_v6 }
 0x475   :  { %2357 = vmatprep.subr.bf16.mxu0 %v3053_v10  ;;  %2389 = vmatprep.subr.bf16.mxu1 %v3057_v14 }
 0x478   :  { %2359 = vmatpush1.bf16.msra.mxu0 %v3061_v17  ;;  %2391 = vmatpush1.bf16.msra.mxu1 %v3065_v19 }
 0x479   :  { %2393 = vmatprep.subr.bf16.mxu0 %v2944_v30  ;;  %2425 = vmatprep.subr.bf16.mxu1 %v2946_v31 }
 0x52e   :  { %v1215_v13 = vpop.f32.mrb[8].mxu0  ;;  %v1286_v16 = vpop.f32.mrb[8].mxu1 }
 0x52f   :  { %v2552_v20 = vadd.f32 %v1215_v13, %v3117_v27  ;;  %v1217_v34 = vpop.f32.mrb[9].mxu0  ;;  %v1288_v35 = vpop.f32.mrb[9].mxu1  ;;  %v2568_v47 = vadd.f32 %v1286_v16, %v3126_v56 }
 0x530   :  { %v2553_v38 = vadd.f32 %v1217_v34, %v3119_v32  ;;  %v2569_v45 = vadd.f32 %v1288_v35, %v3122_v42 }
 0x531   :  { %v1291_v40 = vmul.f32 0.5, %v2552_v20  ;;  %v1293_v49 = vmul.f32 0.5, %v2568_v47 }
 0x532   :  { %v1292_v44 = vmul.f32 0.5, %v2553_v38 }
 0x533   :  { %2661 = vtanh.f32 %v1291_v40 }
 0x534   :  { %2663 = vtanh.f32 %v1292_v44 }
 0x535   :  { %2665 = vtanh.f32 %v2569_v45 }
 0x536   :  { %2667 = vtanh.f32 %v1293_v49 }
 0x53d   :  { %v2662_v52 = vpop.eup %2661 }
 0x53e   :  { %v1297_v53 = vmul.f32 0.5, %v2662_v52  ;;  %v2664_v57 = vpop.eup %2663 }
 0x53f   :  { %v1298_v62 = vmul.f32 0.5, %v2664_v57  ;;  %v2666_v63 = vpop.eup %2665 }
 0x540   :  { %v1300_v60 = vadd.f32 0.5, %v1297_v53  ;;  %v2668_v22 = vpop.eup %2667 }
 0x541   :  { %v1301_v3 = vadd.f32 0.5, %v1298_v62  ;;  %v1299_v23 = vmul.f32 0.5, %v2668_v22 }
 0x542   :  { %v1305_v4 = vmul.f32 %v2666_v63, %v1300_v60 }
 0x543   :  { %v1304_v7 = vmul.f32 %v1301_v3, %v3255_v12  ;;  %v1302_v25 = vadd.f32 0.5, %v1299_v23 }
 0x545   :  { %v3297_v9 = vadd.f32 %v1305_v4, %v1304_v7 }
 0x547   :  { %2669 = vtanh.f32 %v3297_v9 }
 0x551   :  { %v2670_v26 = vpop.eup %2669 }
 0x552   :  { %v1308_v29 = vmul.f32 %v2670_v26, %v1302_v25  ;;  %v1807_v26 = vld [vmem:[#allocation9 + $0x18] sm:$0xff] }
 0x554   :  { %1379 = vmatmul.mubr.f32.vlgmr.msra.gmra.mrb[10].mxu0 %v1308_v29  ;;  %1450 = vmatmul.mubr.f32.vlgmr.msra.gmra.mrb[10].mxu1 %v1308_v29 }
 0x555   :  { %2395 = vmatpush1.bf16.msra.mxu0 %v2950_v36  ;;  %2427 = vmatpush1.bf16.msra.mxu1 %v2955_v39 }
 0x556   :  { %2397 = vmatprep.subr.bf16.mxu0 %v2958_v43  ;;  %2429 = vmatprep.subr.bf16.mxu1 %v2961_v48 }
 0x557   :  { %1543 = vmatprep.mubr.f32.mxu0 %v2827_v0  ;;  %1614 = vmatprep.mubr.f32.mxu1 %v2827_v0 }
 0x559   :  { %2399 = vmatpush1.bf16.msra.mxu0 %v2965_v51  ;;  %2431 = vmatpush1.bf16.msra.mxu1 %v2969_v55 }
 0x55a   :  { %2401 = vmatprep.subr.bf16.mxu0 %v2973_v58  ;;  %2433 = vmatprep.subr.bf16.mxu1 %v2977_v61 }
 0x55d   :  { %2403 = vmatpush1.bf16.msra.mxu0 %v2981_v2  ;;  %2435 = vmatpush1.bf16.msra.mxu1 %v2985_v5 }
 0x55e   :  { %2405 = vmatprep.subr.bf16.mxu0 %v2989_v8  ;;  %2437 = vmatprep.subr.bf16.mxu1 %v2993_v11 }
 0x561   :  { %2407 = vmatpush1.bf16.msra.mxu0 %v2997_v15  ;;  %2439 = vmatpush1.bf16.msra.mxu1 %v3001_v18 }
 0x562   :  { %2409 = vmatprep.subr.bf16.mxu0 %v3005_v21  ;;  %2441 = vmatprep.subr.bf16.mxu1 %v3009_v24 }
 0x565   :  { %2411 = vmatpush1.bf16.msra.mxu0 %v3013_v28  ;;  %2443 = vmatpush1.bf16.msra.mxu1 %v3017_v33 }
 0x566   :  { %2413 = vmatprep.subr.bf16.mxu0 %v3021_v37  ;;  %2445 = vmatprep.subr.bf16.mxu1 %v3025_v41 }
 0x569   :  { %2415 = vmatpush1.bf16.msra.mxu0 %v3029_v46  ;;  %2447 = vmatpush1.bf16.msra.mxu1 %v3033_v50 }
 0x56a   :  { %2417 = vmatprep.subr.bf16.mxu0 %v3037_v54  ;;  %2449 = vmatprep.subr.bf16.mxu1 %v3041_v59 }
 0x56d   :  { %2419 = vmatpush1.bf16.msra.mxu0 %v3045_v1  ;;  %2451 = vmatpush1.bf16.msra.mxu1 %v3049_v6 }
 0x56e   :  { %2421 = vmatprep.subr.bf16.mxu0 %v3053_v10  ;;  %2453 = vmatprep.subr.bf16.mxu1 %v3057_v14 }
 0x571   :  { %2423 = vmatpush1.bf16.msra.mxu0 %v3061_v17  ;;  %2455 = vmatpush1.bf16.msra.mxu1 %v3065_v19 }
 0x572   :  { %2457 = vmatprep.subr.bf16.mxu0 %v2944_v30  ;;  %2489 = vmatprep.subr.bf16.mxu1 %v2946_v31 }
 0x627   :  { %v1380_v12 = vpop.f32.mrb[10].mxu0  ;;  %v1451_v13 = vpop.f32.mrb[10].mxu1 }
 0x628   :  { %v2554_v16 = vadd.f32 %v1380_v12, %v3117_v27  ;;  %v1382_v20 = vpop.f32.mrb[11].mxu0  ;;  %v1453_v34 = vpop.f32.mrb[11].mxu1  ;;  %v2570_v45 = vadd.f32 %v1451_v13, %v3126_v56  ;;  %v1808_v12 = vld [vmem:[#allocation9 + $0x20] sm:$0xff]  ;;  %v1809_v13 = vld [vmem:[#allocation9 + $0x28] sm:$0xff] }
 0x629   :  { %v2555_v35 = vadd.f32 %v1382_v20, %v3119_v32  ;;  %v2571_v44 = vadd.f32 %v1453_v34, %v3122_v42  ;;  %v1810_v20 = vld [vmem:[#allocation9 + $0x30] sm:$0xff]  ;;  %v1811_v34 = vld [vmem:[#allocation9 + $0x38] sm:$0xff] }
 0x62a   :  { %v1456_v38 = vmul.f32 0.5, %v2554_v16  ;;  %v1458_v30 = vmul.f32 0.5, %v2570_v45  ;;  %v2527_v16 = vpack.c.bf16 %v1809_v13, %v1808_v12  ;;  %v1814_v45 = vld [vmem:[#allocation9 + $0x50] sm:$0xff] }
 0x62b   :  { %v1457_v40 = vmul.f32 0.5, %v2555_v35  ;;  %v2530_v35 = vpack.c.bf16 %v1811_v34, %v1810_v20 }
 0x62c   :  { %2671 = vtanh.f32 %v1456_v38  ;;  %v1812_v38 = vld [vmem:[#allocation9 + $0x40] sm:$0xff] }
 0x62d   :  { %2673 = vtanh.f32 %v1457_v40  ;;  %v1813_v40 = vld [vmem:[#allocation9 + $0x48] sm:$0xff] }
 0x62e   :  { %2675 = vtanh.f32 %v2571_v44  ;;  %v2533_v44 = vpack.c.bf16 %v1813_v40, %v1812_v38 }
 0x62f   :  { %2677 = vtanh.f32 %v1458_v30  ;;  %v1815_v30 = vld [vmem:[#allocation9 + $0x58] sm:$0xff] }
 0x636   :  { %v2672_v47 = vpop.eup %2671 }
 0x637   :  { %v1462_v31 = vmul.f32 0.5, %v2672_v47  ;;  %v2674_v49 = vpop.eup %2673  ;;  %v2536_v47 = vpack.c.bf16 %v1815_v30, %v1814_v45 }
 0x638   :  { %v1463_v53 = vmul.f32 0.5, %v2674_v49  ;;  %v2676_v57 = vpop.eup %2675  ;;  %v1817_v49 = vld [vmem:[#allocation9 + $0x68] sm:$0xff] }
 0x639   :  { %v1465_v52 = vadd.f32 0.5, %v1462_v31  ;;  %v2678_v4 = vpop.eup %2677  ;;  %v1816_v31 = vld [vmem:[#allocation9 + $0x60] sm:$0xff] }
 0x63a   :  { %v1466_v60 = vadd.f32 0.5, %v1463_v53  ;;  %v1464_v7 = vmul.f32 0.5, %v2678_v4  ;;  %v1818_v53 = vld [vmem:[#allocation9 + $0x70] sm:$0xff] }
 0x63b   :  { %v1470_v62 = vmul.f32 %v2676_v57, %v1465_v52  ;;  %v2539_v52 = vpack.c.bf16 %v1817_v49, %v1816_v31  ;;  %v1819_v57 = vld [vmem:[#allocation9 + $0x78] sm:$0xff] }
 0x63c   :  { %v1469_v63 = vmul.f32 %v1466_v60, %v3297_v9  ;;  %v1467_v22 = vadd.f32 0.5, %v1464_v7  ;;  %v1806_v9 = vld [vmem:[#allocation9 + $0x10] sm:$0xff]  ;;  %v2542_v60 = vpack.c.bf16 %v1819_v57, %v1818_v53 }
 0x63d   :  { %v2524_v29 = vpack.c.bf16 %v1807_v26, %v1806_v9 }
 0x63e   :  { %v3339_v3 = vadd.f32 %v1470_v62, %v1469_v63 }
 0x640   :  { %2679 = vtanh.f32 %v3339_v3 }
 0x64a   :  { %v2680_v23 = vpop.eup %2679 }
 0x64b   :  { %v1473_v25 = vmul.f32 %v2680_v23, %v1467_v22 }
 0x64d   :  { %1544 = vmatmul.mubr.f32.vlgmr.msra.gmra.mrb[12].mxu0 %v1473_v25  ;;  %1615 = vmatmul.mubr.f32.vlgmr.msra.gmra.mrb[12].mxu1 %v1473_v25 }
 0x64e   :  { %2459 = vmatpush1.bf16.msra.mxu0 %v2950_v36  ;;  %2491 = vmatpush1.bf16.msra.mxu1 %v2955_v39 }
 0x64f   :  { %2461 = vmatprep.subr.bf16.mxu0 %v2958_v43  ;;  %2493 = vmatprep.subr.bf16.mxu1 %v2961_v48 }
 0x650   :  { %1708 = vmatprep.mubr.f32.mxu0 %v2827_v0  ;;  %1779 = vmatprep.mubr.f32.mxu1 %v2827_v0 }
 0x652   :  { %2463 = vmatpush1.bf16.msra.mxu0 %v2965_v51  ;;  %2495 = vmatpush1.bf16.msra.mxu1 %v2969_v55 }
 0x653   :  { %2465 = vmatprep.subr.bf16.mxu0 %v2973_v58  ;;  %2497 = vmatprep.subr.bf16.mxu1 %v2977_v61 }
 0x656   :  { %2467 = vmatpush1.bf16.msra.mxu0 %v2981_v2  ;;  %2499 = vmatpush1.bf16.msra.mxu1 %v2985_v5 }
 0x657   :  { %2469 = vmatprep.subr.bf16.mxu0 %v2989_v8  ;;  %2501 = vmatprep.subr.bf16.mxu1 %v2993_v11 }
 0x65a   :  { %2471 = vmatpush1.bf16.msra.mxu0 %v2997_v15  ;;  %2503 = vmatpush1.bf16.msra.mxu1 %v3001_v18 }
 0x65b   :  { %2473 = vmatprep.subr.bf16.mxu0 %v3005_v21  ;;  %2505 = vmatprep.subr.bf16.mxu1 %v3009_v24 }
 0x65e   :  { %2475 = vmatpush1.bf16.msra.mxu0 %v3013_v28  ;;  %2507 = vmatpush1.bf16.msra.mxu1 %v3017_v33 }
 0x65f   :  { %2477 = vmatprep.subr.bf16.mxu0 %v3021_v37  ;;  %2509 = vmatprep.subr.bf16.mxu1 %v3025_v41 }
 0x662   :  { %2479 = vmatpush1.bf16.msra.mxu0 %v3029_v46  ;;  %2511 = vmatpush1.bf16.msra.mxu1 %v3033_v50 }
 0x663   :  { %2481 = vmatprep.subr.bf16.mxu0 %v3037_v54  ;;  %2513 = vmatprep.subr.bf16.mxu1 %v3041_v59 }
 0x666   :  { %2483 = vmatpush1.bf16.msra.mxu0 %v3045_v1  ;;  %2515 = vmatpush1.bf16.msra.mxu1 %v3049_v6 }
 0x667   :  { %2485 = vmatprep.subr.bf16.mxu0 %v3053_v10  ;;  %2517 = vmatprep.subr.bf16.mxu1 %v3057_v14  ;;  %v1804_v10 = vld [vmem:[#allocation9] sm:$0xff]  ;;  %v1805_v14 = vld [vmem:[#allocation9 + $0x8] sm:$0xff] }
 0x66a   :  { %2487 = vmatpush1.bf16.msra.mxu0 %v3061_v17  ;;  %2519 = vmatpush1.bf16.msra.mxu1 %v3065_v19  ;;  %v2521_v17 = vpack.c.bf16 %v1805_v14, %v1804_v10  ;;  %v2829_v19 = vmov 0.0|0.0  }
 0x66b   :  { %2520 = vmatprep.subr.bf16.mxu0 %v2829_v19 }
 0x720   :  { %v1545_v36 = vpop.f32.mrb[12].mxu0  ;;  %v1616_v39 = vpop.f32.mrb[12].mxu1 }
 0x721   :  { %v2556_v43 = vadd.f32 %v1545_v36, %v3117_v27  ;;  %v1547_v48 = vpop.f32.mrb[13].mxu0  ;;  %v1618_v51 = vpop.f32.mrb[13].mxu1  ;;  %v2572_v5 = vadd.f32 %v1616_v39, %v3126_v56 }
 0x722   :  { %v2557_v55 = vadd.f32 %v1547_v48, %v3119_v32  ;;  %v2573_v2 = vadd.f32 %v1618_v51, %v3122_v42 }
 0x723   :  { %v1621_v58 = vmul.f32 0.5, %v2556_v43  ;;  %v1623_v8 = vmul.f32 0.5, %v2572_v5 }
 0x724   :  { %v1622_v61 = vmul.f32 0.5, %v2557_v55 }
 0x725   :  { %2681 = vtanh.f32 %v1621_v58 }
 0x726   :  { %2683 = vtanh.f32 %v1622_v61 }
 0x727   :  { %2685 = vtanh.f32 %v2573_v2 }
 0x728   :  { %2687 = vtanh.f32 %v1623_v8 }
 0x72f   :  { %v2682_v11 = vpop.eup %2681 }
 0x730   :  { %v1627_v15 = vmul.f32 0.5, %v2682_v11  ;;  %v2684_v18 = vpop.eup %2683 }
 0x731   :  { %v1628_v24 = vmul.f32 0.5, %v2684_v18  ;;  %v2686_v28 = vpop.eup %2685 }
 0x732   :  { %v1630_v21 = vadd.f32 0.5, %v1627_v15  ;;  %v2688_v50 = vpop.eup %2687 }
 0x733   :  { %v1631_v33 = vadd.f32 0.5, %v1628_v24  ;;  %v1629_v54 = vmul.f32 0.5, %v2688_v50 }
 0x734   :  { %v1635_v37 = vmul.f32 %v2686_v28, %v1630_v21 }
 0x735   :  { %v1634_v41 = vmul.f32 %v1631_v33, %v3339_v3  ;;  %v1632_v59 = vadd.f32 0.5, %v1629_v54 }
 0x737   :  { %v3379_v46 = vadd.f32 %v1635_v37, %v1634_v41 }
 0x739   :  { %2689 = vtanh.f32 %v3379_v46 }
 0x743   :  { %v2690_v1 = vpop.eup %2689 }
 0x744   :  { %v1638_v6 = vmul.f32 %v2690_v1, %v1632_v59 }
 0x746   :  { %1709 = vmatmul.mubr.f32.vlgmr.msra.gmra.mrb[14].mxu0 %v1638_v6  ;;  %1780 = vmatmul.mubr.f32.vlgmr.msra.gmra.mrb[14].mxu1 %v1638_v6 }
 0x747   :  { %2522 = vmatpush3.bf16.msra.mxu0 %v2521_v17  ;;  %1985 = vmatprep.mubr.msk.f32.mxu0 %vm2830_vm4, %v2827_v0 }
 0x748   :  { %2523 = vmatprep.subr.bf16.mxu0 %v2829_v19 }
 0x74b   :  { %2525 = vmatpush3.bf16.msra.mxu0 %v2524_v29 }
 0x74c   :  { %2526 = vmatprep.subr.bf16.mxu0 %v2829_v19 }
 0x74f   :  { %2528 = vmatpush3.bf16.msra.mxu0 %v2527_v16 }
 0x750   :  { %2529 = vmatprep.subr.bf16.mxu0 %v2829_v19 }
 0x753   :  { %2531 = vmatpush3.bf16.msra.mxu0 %v2530_v35 }
 0x754   :  { %2532 = vmatprep.subr.bf16.mxu0 %v2829_v19 }
 0x757   :  { %2534 = vmatpush3.bf16.msra.mxu0 %v2533_v44 }
 0x758   :  { %2535 = vmatprep.subr.bf16.mxu0 %v2829_v19 }
 0x75b   :  { %2537 = vmatpush3.bf16.msra.mxu0 %v2536_v47 }
 0x75c   :  { %2538 = vmatprep.subr.bf16.mxu0 %v2829_v19 }
 0x75f   :  { %2540 = vmatpush3.bf16.msra.mxu0 %v2539_v52 }
 0x760   :  { %2541 = vmatprep.subr.bf16.mxu0 %v2829_v19 }
 0x763   :  { %2543 = vmatpush3.bf16.msra.mxu0 %v2542_v60 }
 0x819   :  { %v1710_v62 = vpop.f32.mrb[14].mxu0  ;;  %v1781_v63 = vpop.f32.mrb[14].mxu1 }
 0x81a   :  { %v2558_v3 = vadd.f32 %v1710_v62, %v3117_v27  ;;  %v1712_v4 = vpop.f32.mrb[15].mxu0  ;;  %v1783_v7 = vpop.f32.mrb[15].mxu1  ;;  %v2574_v36 = vadd.f32 %v1781_v63, %v3126_v56  ;;  %v1935_v56 = vld [vmem:[%s3408_s5] ss:$0 sm:$0xff] }
 0x81b   :  { %v2559_v22 = vadd.f32 %v1712_v4, %v3119_v32  ;;  %v2575_v0 = vadd.f32 %v1783_v7, %v3122_v42 }
 0x81c   :  { %v1786_v23 = vmul.f32 0.5, %v2558_v3  ;;  %v1788_v39 = vmul.f32 0.5, %v2574_v36 }
 0x81d   :  { %v1787_v25 = vmul.f32 0.5, %v2559_v22 }
 0x81e   :  { %2691 = vtanh.f32 %v1786_v23 }
 0x81f   :  { %2693 = vtanh.f32 %v1787_v25 }
 0x820   :  { %2695 = vtanh.f32 %v2575_v0 }
 0x821   :  { %2697 = vtanh.f32 %v1788_v39 }
 0x828   :  { %v2692_v43 = vpop.eup %2691 }
 0x829   :  { %v1792_v48 = vmul.f32 0.5, %v2692_v43  ;;  %v2694_v51 = vpop.eup %2693 }
 0x82a   :  { %v1793_v27 = vmul.f32 0.5, %v2694_v51  ;;  %v2696_v58 = vpop.eup %2695 }
 0x82b   :  { %v1795_v55 = vadd.f32 0.5, %v1792_v48  ;;  %v2698_v8 = vpop.eup %2697 }
 0x82c   :  { %v1796_v61 = vadd.f32 0.5, %v1793_v27  ;;  %v1794_v42 = vmul.f32 0.5, %v2698_v8 }
 0x82d   :  { %v1800_v2 = vmul.f32 %v2696_v58, %v1795_v55 }
 0x82e   :  { %v1799_v32 = vmul.f32 %v1796_v61, %v3379_v46  ;;  %v1797_v11 = vadd.f32 0.5, %v1794_v42 }
 0x830   :  { %v1801_v5 = vadd.f32 %v1800_v2, %v1799_v32 }
 0x832   :  { %2699 = vtanh.f32 %v1801_v5 }
 0x83c   :  { %v2700_v15 = vpop.eup %2699 }
 0x83d   :  { %v1803_v18 = vmul.f32 %v2700_v15, %v1797_v11 }
 0x83f   :  { %1986 = vmatmul.mubr.f32.vlgmr.msra.gmra.mrb[16].mxu0 %v1803_v18 }
 0x912   :  { %v1893_v21 = vpop.f32.mrb[16].mxu0 }
 0x913   :  { %v1894_v24 = vadd.f32 %v1935_v56, %v1893_v21  ;;  %v1987_v28 = vpop.f32.mrb[17].mxu0 }
 0x915   :  { %1897 = vst [vmem:[#allocation11] sm:$0xff] %v1894_v24 }
 0x916   :  { %2800 = shalt.err (!%p2797_p8)
}
 0x917   :  { %s2801_s28 = scalar_lea.hbm %s3409_s6, 128 }
 0x918   :  { %p2802_p9 = scmp.ne.s32.totalorder %s3409_s6, %s2801_s28  ;;  %p2805_p10 = scmp.lt.u32.totalorder %s2801_s28, %s3409_s6 }
 0x91a   :  { %p2807_p11 = pnand %p2805_p10, %p2802_p9 }
 0x91c   :  { %2810 = shalt.err (!%p2807_p11)
}
 0x91d   :  { %1907 = dma.vmem_to_hbm [thread:$0]  %s1905_s24, 128, %s3409_s6, [#allocation5]  }
 0x91e   :  { %2817 = dma.done.wait [#allocation5], 128  }
 0x91f   :  { %2818 = vsyncadd [#allocation5], 4294967168 }
 0x920   :  { %1911 = vsyncpa [#allocation4], 1 }
 0x921   :  { %1912 = vsyncpa [#allocation7], 1 }
 0x922   :  { %1913 = vsyncpa [#allocation10], 1 }
 0x923   :  { %1914 = vsyncpa [#allocation5], 1 }

</bundles_post_ra>
